<compile_context>
chip_gen: v5e
topology: v5e:2x2
jax: 0.10.0
libtpu: 0.0.40
codegen_flags: <defaults>
</compile_context>

<pallas_src>
import functools

import jax
import jax.numpy as jnp
from jax.experimental import pallas as pl
from jax.experimental.pallas import tpu as pltpu


C_PAD = 128          # lane-padded class dimension used for in-kernel compute only
_NEG_INF = -1e30     # finite "minus infinity": padded lanes never produce NaNs


def _round_up(n, m):
    return ((n + m - 1) // m) * m


def _fair_cls_kernel(gender_ref, emb_ref, w1_ref, b1_ref, w2_ref, b2_ref,
                     probs_ref, nll_ref):
    tb = emb_ref.shape[0]
    c_pad = w2_ref.shape[1]
    nc = probs_ref.shape[1]                                       # real #classes

    emb = emb_ref[...]                                            # (TB, H) f32

    # fc1 + ReLU (MXU, f32 accumulate)
    h = jnp.dot(emb, w1_ref[...], preferred_element_type=jnp.float32)
    h = jnp.maximum(h + b1_ref[...], 0.0)                         # (TB, H)

    # fc2 -> logits on a lane-padded class tile (TB, C_PAD).
    # Padded lanes already carry -1e30 via the padded bias (their W2 columns are
    # zero), so no in-kernel compare/select mask is needed.
    logits = jnp.dot(h, w2_ref[...], preferred_element_type=jnp.float32)
    logits = logits + b2_ref[...]

    # softmax(dim=1): padded lanes contribute exp(-1e30 - m) == 0.
    m = jnp.max(logits, axis=-1, keepdims=True)                   # (TB, 1)
    e = jnp.exp(logits - m)                                       # (TB, C_PAD)
    s = jnp.sum(e, axis=-1, keepdims=True)                        # (TB, 1)
    probs = e * pl.reciprocal(s, approx=False)                    # (TB, C_PAD)
    probs_ref[...] = probs[:, :nc]                                # store only real classes

    # Per-row cross-entropy: logsumexp - logit[gender].
    lse = m + jnp.log(s)                                          # (TB, 1)
    col = jax.lax.broadcasted_iota(jnp.int32, (tb, c_pad), 1)
    onehot = (col == gender_ref[...]).astype(jnp.float32)         # padded cols never match
    picked = jnp.sum(logits * onehot, axis=-1, keepdims=True)     # (TB, 1)
    nll_ref[...] = lse - picked                                   # per-row NLL (no carry)


def prepare_params(w1, b1, w2, b2):
    """One-time padding/casting of the fc weights (hoisted out of the hot path).

    Folds the padded-class mask into b2: padded lanes get -1e30 so they vanish
    from softmax / CE with zero in-kernel masking work."""
    H = w1.shape[0]
    C = w2.shape[1]
    w1f = w1.astype(jnp.float32)
    b1f = b1.astype(jnp.float32).reshape(1, H)
    w2_p = jnp.zeros((H, C_PAD), jnp.float32).at[:, :C].set(w2.astype(jnp.float32))
    b2_p = jnp.full((1, C_PAD), _NEG_INF, jnp.float32).at[:, :C].set(
        b2.astype(jnp.float32).reshape(1, C))
    return w1f, b1f, w2_p, b2_p


def fair_classifier_forward(x, user_emb, w1f, b1f, w2_p, b2_p, num_classes,
                            *, block_b=1024):
    """Pallas forward of fair_classifier.

    Returns (softmax_probs [B, C], gender_idx [B], loss scalar)."""
    B, H = user_emb.shape

    gender_idx = x[:, 0].astype(jnp.int32)        # matches `gender_idx = x[:, 0]`

    # Batch tiling: TB rows per grid step (multiple of 8).  For B up to ~1K the
    # whole batch fits in a single grid step (per-step VMEM is ~1.5 MiB even at
    # tb=1024, far inside every generation's VMEM budget).
    tb = min(block_b, _round_up(B, 8))
    b_pad = _round_up(B, tb)
    grid = (b_pad // tb,)

    emb_p = jnp.zeros((b_pad, H), jnp.float32).at[:B].set(user_emb.astype(jnp.float32))
    gender_p = jnp.zeros((b_pad, 1), jnp.int32).at[:B, 0].set(gender_idx)

    flops = 2 * b_pad * H * (H + C_PAD) + 12 * b_pad * C_PAD
    transcendentals = b_pad * (C_PAD + 1)
    bytes_accessed = 4 * (b_pad * (H + 1 + num_classes + 1)
                          + H * H + H + H * C_PAD + C_PAD)

    probs, nll = pl.pallas_call(
        _fair_cls_kernel,
        grid=grid,
        in_specs=[
            pl.BlockSpec((tb, 1), lambda i: (i, 0)),        # gender (narrow int32)
            pl.BlockSpec((tb, H), lambda i: (i, 0)),        # user_emb block
            pl.BlockSpec((H, H), lambda i: (0, 0)),         # W1 (resident)
            pl.BlockSpec((1, H), lambda i: (0, 0)),         # b1 (resident)
            pl.BlockSpec((H, C_PAD), lambda i: (0, 0)),     # W2 padded (resident)
            pl.BlockSpec((1, C_PAD), lambda i: (0, 0)),     # b2 padded (resident)
        ],
        out_specs=[
            pl.BlockSpec((tb, num_classes), lambda i: (i, 0)),  # probs, real C cols only
            pl.BlockSpec((tb, 1), lambda i: (i, 0)),            # per-row NLL
        ],
        out_shape=(
            jax.ShapeDtypeStruct((b_pad, num_classes), jnp.float32),
            jax.ShapeDtypeStruct((b_pad, 1), jnp.float32),
        ),
        compiler_params=pltpu.CompilerParams(
            # All per-block outputs are independent -> batch axis is parallel
            # (shards across v7x's two TensorCores; neutral on v5e/v6e).
            dimension_semantics=("parallel",),
            vmem_limit_bytes=32 * 1024 * 1024,
        ),
        cost_estimate=pl.CostEstimate(
            flops=flops,
            transcendentals=transcendentals,
            bytes_accessed=bytes_accessed,
        ),
    )(gender_p, emb_p, w1f, b1f, w2_p, b2_p)

    # Mean CE over the *real* rows (padded rows are simply sliced away).
    loss = jnp.sum(nll[:B, 0]) * (1.0 / B)
    return probs[:B], gender_idx, loss


def init_params(key, hidden, num_classes):
    """Deterministic param init mimicking PyTorch Linear default (uniform +-1/sqrt(fan_in))."""
    k1, k2, k3, k4 = jax.random.split(key, 4)
    bound1 = 1.0 / jnp.sqrt(hidden)
    w1 = jax.random.uniform(k1, (hidden, hidden), jnp.float32, -bound1, bound1)
    b1 = jax.random.uniform(k2, (1, hidden), jnp.float32, -bound1, bound1)
    bound2 = 1.0 / jnp.sqrt(hidden)
    w2 = jax.random.uniform(k3, (hidden, num_classes), jnp.float32, -bound2, bound2)
    b2 = jax.random.uniform(k4, (1, num_classes), jnp.float32, -bound2, bound2)
    return w1, b1, w2, b2


def _reference(gender, emb, w1, b1, w2, b2):
    """Pure-JAX reference matching the PyTorch module in f32."""
    h = jnp.maximum(emb @ w1 + b1, 0.0)
    logits = h @ w2 + b2
    m = jnp.max(logits, axis=1, keepdims=True)
    e = jnp.exp(logits - m)
    probs = e / jnp.sum(e, axis=1, keepdims=True)
    lse = m[:, 0] + jnp.log(jnp.sum(e, axis=1))
    picked = jnp.take_along_axis(logits, gender[:, None], axis=1)[:, 0]
    loss = jnp.mean(lse - picked)
    return probs, loss


if __name__ == "__main__":
    # Config: first_fc_hidden_dim = 64 -> fc dims = 32; num_gender = 2.
    # B in the hundreds (not a multiple of 8) exercises the row padding while
    # still collapsing to a single grid step with the larger batch tile.
    B = 200
    HIDDEN = 32
    NUM_GENDER = 2

    key = jax.random.PRNGKey(0)
    kx, kemb, kparam = jax.random.split(key, 3)

    # x: [B, 4] categorical indices (gender, age, occupation, area)
    x = jnp.stack(
        [
            jax.random.randint(jax.random.fold_in(kx, 0), (B,), 0, NUM_GENDER),
            jax.random.randint(jax.random.fold_in(kx, 1), (B,), 0, 7),
            jax.random.randint(jax.random.fold_in(kx, 2), (B,), 0, 21),
            jax.random.randint(jax.random.fold_in(kx, 3), (B,), 0, 30),
        ],
        axis=1,
    ).astype(jnp.int32)

    user_emb = jax.random.normal(kemb, (B, HIDDEN), jnp.float32)
    w1, b1, w2, b2 = init_params(kparam, HIDDEN, NUM_GENDER)

    # One-time weight padding/casting (hoisted out of the per-call path).
    w1f, b1f, w2_p, b2_p = jax.block_until_ready(prepare_params(w1, b1, w2, b2))

    # Jit the forward so the batch padding / slicing fuse around the kernel.
    forward = jax.jit(
        functools.partial(fair_classifier_forward, num_classes=NUM_GENDER))

    probs, gender_idx, loss = forward(x, user_emb, w1f, b1f, w2_p, b2_p)
    jax.block_until_ready((probs, gender_idx, loss))

    # Sanity + correctness vs pure-JAX reference.
    ref_probs, ref_loss = _reference(x[:, 0], user_emb, w1, b1, w2, b2)
    assert probs.shape == (B, NUM_GENDER)
    assert bool(jnp.all(jnp.abs(jnp.sum(probs, axis=1) - 1.0) < 1e-5))
    assert bool(jnp.allclose(probs, ref_probs, atol=1e-5, rtol=1e-5))
    assert bool(jnp.allclose(loss, ref_loss, atol=1e-5, rtol=1e-5))
    assert bool(jnp.all(gender_idx == x[:, 0]))
    assert bool(jnp.isfinite(loss))

    print("KERNEL_OK")
</pallas_src>

<mosaic_0001>
module attributes {stable_mosaic.version = 11 : i64} {
  func.func @_fair_cls_kernel(%arg0: i32, %arg1: memref<200x1xi32, #tpu.memory_space<vmem>>, %arg2: memref<200x32xf32, #tpu.memory_space<vmem>>, %arg3: memref<32x32xf32, #tpu.memory_space<vmem>>, %arg4: memref<1x32xf32, #tpu.memory_space<vmem>>, %arg5: memref<32x128xf32, #tpu.memory_space<vmem>>, %arg6: memref<1x128xf32, #tpu.memory_space<vmem>>, %arg7: memref<200x2xf32, #tpu.memory_space<vmem>>, %arg8: memref<200x1xf32, #tpu.memory_space<vmem>>) attributes {dimension_semantics = [#tpu.dimension_semantics<parallel>], iteration_bounds = array<i64: 1>, scalar_prefetch = 0 : i64, scratch_operands = 0 : i64, tpu.core_type = #tpu.core_type<tc>, window_params = [{transform_indices = @transform_0, window_bounds = array<i64: 200, 1>}, {transform_indices = @transform_1, window_bounds = array<i64: 200, 32>}, {pipeline_mode = #tpu.pipeline_mode<synchronous>, transform_indices = @transform_2, window_bounds = array<i64: 32, 32>}, {pipeline_mode = #tpu.pipeline_mode<synchronous>, transform_indices = @transform_3, window_bounds = array<i64: 1, 32>}, {pipeline_mode = #tpu.pipeline_mode<synchronous>, transform_indices = @transform_4, window_bounds = array<i64: 32, 128>}, {pipeline_mode = #tpu.pipeline_mode<synchronous>, transform_indices = @transform_5, window_bounds = array<i64: 1, 128>}, {transform_indices = @transform_6, window_bounds = array<i64: 200, 2>}, {transform_indices = @transform_7, window_bounds = array<i64: 200, 1>}]} {
    %c0 = arith.constant 0 : index
    %c0_0 = arith.constant 0 : index
    %0 = vector.load %arg2[%c0, %c0_0] : memref<200x32xf32, #tpu.memory_space<vmem>>, vector<200x32xf32>
    %c0_1 = arith.constant 0 : index
    %c0_2 = arith.constant 0 : index
    %1 = vector.load %arg3[%c0_1, %c0_2] : memref<32x32xf32, #tpu.memory_space<vmem>>, vector<32x32xf32>
    %cst = arith.constant dense<0.000000e+00> : vector<200x32xf32>
    %2 = tpu.matmul %0, %1, %cst {dimension_numbers = #tpu.dot_dimension_numbers<[1], [0], [0], [1], [0, 0, 1, 1], [], []>} : vector<200x32xf32>, vector<32x32xf32>, vector<200x32xf32> -> vector<200x32xf32>
    %c0_3 = arith.constant 0 : index
    %c0_4 = arith.constant 0 : index
    %3 = vector.load %arg4[%c0_3, %c0_4] : memref<1x32xf32, #tpu.memory_space<vmem>>, vector<1x32xf32>
    %4 = vector.broadcast %3 : vector<1x32xf32> to vector<200x32xf32>
    %5 = arith.addf %2, %4 : vector<200x32xf32>
    %cst_5 = arith.constant 0.000000e+00 : f32
    %6 = vector.broadcast %cst_5 : f32 to vector<200x32xf32>
    %7 = arith.maximumf %5, %6 : vector<200x32xf32>
    %c0_6 = arith.constant 0 : index
    %c0_7 = arith.constant 0 : index
    %8 = vector.load %arg5[%c0_6, %c0_7] : memref<32x128xf32, #tpu.memory_space<vmem>>, vector<32x128xf32>
    %cst_8 = arith.constant dense<0.000000e+00> : vector<200x128xf32>
    %9 = tpu.matmul %7, %8, %cst_8 {dimension_numbers = #tpu.dot_dimension_numbers<[1], [0], [0], [1], [0, 0, 1, 1], [], []>} : vector<200x32xf32>, vector<32x128xf32>, vector<200x128xf32> -> vector<200x128xf32>
    %c0_9 = arith.constant 0 : index
    %c0_10 = arith.constant 0 : index
    %10 = vector.load %arg6[%c0_9, %c0_10] : memref<1x128xf32, #tpu.memory_space<vmem>>, vector<1x128xf32>
    %11 = vector.broadcast %10 : vector<1x128xf32> to vector<200x128xf32>
    %12 = arith.addf %9, %11 : vector<200x128xf32>
    %cst_11 = arith.constant dense<0xFF800000> : vector<200xf32>
    %13 = vector.multi_reduction <maximumf>, %12, %cst_11 [1] : vector<200x128xf32> to vector<200xf32>
    %14 = vector.shape_cast %13 : vector<200xf32> to vector<200x1xf32>
    %15 = vector.broadcast %14 : vector<200x1xf32> to vector<200x128xf32>
    %16 = arith.subf %12, %15 : vector<200x128xf32>
    %17 = math.exp %16 : vector<200x128xf32>
    %cst_12 = arith.constant dense<0.000000e+00> : vector<200xf32>
    %18 = vector.multi_reduction <add>, %17, %cst_12 [1] : vector<200x128xf32> to vector<200xf32>
    %19 = vector.shape_cast %18 : vector<200xf32> to vector<200x1xf32>
    %20 = tpu.reciprocal %19 : vector<200x1xf32> -> vector<200x1xf32>
    %21 = vector.broadcast %20 : vector<200x1xf32> to vector<200x128xf32>
    %22 = arith.mulf %17, %21 : vector<200x128xf32>
    %23 = vector.extract_strided_slice %22 {offsets = [0, 0], sizes = [200, 2], strides = [1, 1]} : vector<200x128xf32> to vector<200x2xf32>
    %c0_13 = arith.constant 0 : index
    %c0_14 = arith.constant 0 : index
    %24 = vector.load %arg7[%c0_13, %c0_14] : memref<200x2xf32, #tpu.memory_space<vmem>>, vector<200x2xf32>
    tpu.vector_store %arg7[%c0_13, %c0_14], %23 {strides = array<i32>} : memref<200x2xf32, #tpu.memory_space<vmem>>, vector<200x2xf32>,
    %25 = math.log %19 : vector<200x1xf32>
    %26 = arith.addf %14, %25 : vector<200x1xf32>
    %27 = tpu.iota {dimensions = array<i32: 1>} : vector<200x128xi32>
    %c0_15 = arith.constant 0 : index
    %c0_16 = arith.constant 0 : index
    %28 = vector.load %arg1[%c0_15, %c0_16] : memref<200x1xi32, #tpu.memory_space<vmem>>, vector<200x1xi32>
    %29 = vector.broadcast %28 : vector<200x1xi32> to vector<200x128xi32>
    %30 = arith.cmpi eq, %27, %29 : vector<200x128xi32>
    %31 = arith.extui %30 : vector<200x128xi1> to vector<200x128xi32>
    %32 = arith.sitofp %31 : vector<200x128xi32> to vector<200x128xf32>
    %33 = arith.mulf %12, %32 : vector<200x128xf32>
    %cst_17 = arith.constant dense<0.000000e+00> : vector<200xf32>
    %34 = vector.multi_reduction <add>, %33, %cst_17 [1] : vector<200x128xf32> to vector<200xf32>
    %35 = vector.shape_cast %34 : vector<200xf32> to vector<200x1xf32>
    %36 = arith.subf %26, %35 : vector<200x1xf32>
    %c0_18 = arith.constant 0 : index
    %c0_19 = arith.constant 0 : index
    %37 = vector.load %arg8[%c0_18, %c0_19] : memref<200x1xf32, #tpu.memory_space<vmem>>, vector<200x1xf32>
    tpu.vector_store %arg8[%c0_18, %c0_19], %36 {strides = array<i32>} : memref<200x1xf32, #tpu.memory_space<vmem>>, vector<200x1xf32>,
    return
  }
  func.func @transform_0(%arg0: i32) -> (i32, i32) {
    %c0_i32 = arith.constant 0 : i32
    %c0_i32_0 = arith.constant 0 : i32
    return %arg0, %c0_i32 : i32, i32
  }
  func.func @transform_1(%arg0: i32) -> (i32, i32) {
    %c0_i32 = arith.constant 0 : i32
    %c0_i32_0 = arith.constant 0 : i32
    return %arg0, %c0_i32 : i32, i32
  }
  func.func @transform_2(%arg0: i32) -> (i32, i32) {
    %c0_i32 = arith.constant 0 : i32
    %c0_i32_0 = arith.constant 0 : i32
    %c0_i32_1 = arith.constant 0 : i32
    return %c0_i32, %c0_i32_0 : i32, i32
  }
  func.func @transform_3(%arg0: i32) -> (i32, i32) {
    %c0_i32 = arith.constant 0 : i32
    %c0_i32_0 = arith.constant 0 : i32
    %c0_i32_1 = arith.constant 0 : i32
    return %c0_i32, %c0_i32_0 : i32, i32
  }
  func.func @transform_4(%arg0: i32) -> (i32, i32) {
    %c0_i32 = arith.constant 0 : i32
    %c0_i32_0 = arith.constant 0 : i32
    %c0_i32_1 = arith.constant 0 : i32
    return %c0_i32, %c0_i32_0 : i32, i32
  }
  func.func @transform_5(%arg0: i32) -> (i32, i32) {
    %c0_i32 = arith.constant 0 : i32
    %c0_i32_0 = arith.constant 0 : i32
    %c0_i32_1 = arith.constant 0 : i32
    return %c0_i32, %c0_i32_0 : i32, i32
  }
  func.func @transform_6(%arg0: i32) -> (i32, i32) {
    %c0_i32 = arith.constant 0 : i32
    %c0_i32_0 = arith.constant 0 : i32
    return %arg0, %c0_i32 : i32, i32
  }
  func.func @transform_7(%arg0: i32) -> (i32, i32) {
    %c0_i32 = arith.constant 0 : i32
    %c0_i32_0 = arith.constant 0 : i32
    return %arg0, %c0_i32 : i32, i32
  }
}

</mosaic_0001>

<bundles_post_ra>
// kernel: fair_classifier_forward.1
= control target key start
LH: loop header
LB: loop body
LE: loop exit
PB: predicated region body
PF: predicated region fallthrough
CT: control target
= control target key end

     0   :  { %vm58_vm0 = vcmask 261120   ;;  %v1628_v12 = vmov 0   ;;  %s2951_s2 = inlined_call_operand.vmem [shape: f32[32,32], index: 2, kind: input, shape index: {}]   ;;  %s2952_s1 = inlined_call_operand.vmem [shape: f32[200,32], index: 1, kind: input, shape index: {}]   ;;  %s2953_s3 = inlined_call_operand.vmem [shape: f32[1,32], index: 3, kind: input, shape index: {}]   ;;  %s2954_s0 = inlined_call_operand.vmem [shape: s32[200,1], index: 0, kind: input, shape index: {}]   ;;  %s2955_s4 = inlined_call_operand.vmem [shape: f32[32,128], index: 4, kind: input, shape index: {}]   ;;  %s2956_s5 = inlined_call_operand.vmem [shape: f32[1,128], index: 5, kind: input, shape index: {}]   ;;  %s2957_s7 = inlined_call_operand.vmem [shape: f32[200,1], index: 7, kind: output, shape index: {1}]   ;;  %s2958_s6 = inlined_call_operand.vmem [shape: f32[200,2], index: 6, kind: output, shape index: {0}]  }
   0x1   :  { %v53_v0 = vld [vmem:[%s2951_s2 + $0x18] sm:$0xff]  ;;  %v52_v1 = vld [vmem:[%s2951_s2 + $0x10] sm:$0xff]  ;;  %v51_v2 = vld [vmem:[%s2951_s2 + $0x8] sm:$0xff]  ;;  %1475 = vset.pattern.permute.xlu1 %v1628_v12  ;;  %1473 = vset.pattern.permute.xlu2 %v1628_v12 }
   0x2   :  { %146 = vmatpush.msra.mxu0 %v53_v0  ;;  %1463 = vmatpush.msra.mxu2 %v53_v0  ;;  %v50_v3 = vld [vmem:[%s2951_s2] sm:$0xff]  ;;  %v38_v5 = vld [vmem:[%s2952_s1 + $0x68] sm:$0xff]  ;;  %v39_v7 = vld [vmem:[%s2952_s1 + $0x70] sm:$0xff] }
   0x3   :  { %v25_v4 = vld [vmem:[%s2952_s1] sm:$0xff]  ;;  %v26_v6 = vld [vmem:[%s2952_s1 + $0x8] sm:$0xff]  ;;  %v27_v8 = vld [vmem:[%s2952_s1 + $0x10] sm:$0xff]  ;;  %1474 = vset.pattern.permute.xlu0 %v1628_v12 }
   0x4   :  { %147 = vmatpush.msra.mxu0 %v52_v1  ;;  %1464 = vmatpush.msra.mxu2 %v52_v1  ;;  %v40_v9 = vld [vmem:[%s2952_s1 + $0x78] sm:$0xff]  ;;  %v41_v11 = vld [vmem:[%s2952_s1 + $0x80] sm:$0xff]  ;;  %v42_v14 = vld [vmem:[%s2952_s1 + $0x88] sm:$0xff] }
   0x5   :  { %v28_v10 = vld [vmem:[%s2952_s1 + $0x18] sm:$0xff]  ;;  %v29_v13 = vld [vmem:[%s2952_s1 + $0x20] sm:$0xff]  ;;  %v1081_v15 = vld [vmem:[%s2954_s0 + $0x10] sm:$0xff] }
   0x6   :  { %148 = vmatpush.msra.mxu0 %v51_v2  ;;  %1465 = vmatpush.msra.mxu2 %v51_v2  ;;  %v30_v16 = vld [vmem:[%s2952_s1 + $0x28] sm:$0xff]  ;;  %v43_v17 = vld [vmem:[%s2952_s1 + $0x90] sm:$0xff]  ;;  %v44_v20 = vld [vmem:[%s2952_s1 + $0x98] sm:$0xff] }
   0x7   :  { %1111 = vperm.xlu1 %1475, %v1081_v15   ;;  %v1084_v18 = vld [vmem:[%s2954_s0 + $0x28] sm:$0xff]  ;;  %v31_v19 = vld [vmem:[%s2952_s1 + $0x30] sm:$0xff]  ;;  %v1086_v21 = vld [vmem:[%s2954_s0 + $0x38] sm:$0xff] }
   0x8   :  { %149 = vmatpush.msra.mxu0 %v50_v3  ;;  %1466 = vmatpush.msra.mxu2 %v50_v3  ;;  %v1079_v22 = vld [vmem:[%s2954_s0] sm:$0xff]  ;;  %v32_v23 = vld [vmem:[%s2952_s1 + $0x38] sm:$0xff]  ;;  %v1089_v25 = vld [vmem:[%s2954_s0 + $0x50] sm:$0xff] }
   0x9   :  { %1388 = vmatmul.msk.f32.vlgmr.msra.gmra.mxu0 %vm58_vm0, %v25_v4  ;;  %1401 = vmatmul.msk.f32.vlgmr.msra.gmra.mxu2 %vm58_vm0, %v38_v5  ;;  %v45_v24 = vld [vmem:[%s2952_s1 + $0xa0] sm:$0xff]  ;;  %v1082_v26 = vld [vmem:[%s2954_s0 + $0x18] sm:$0xff]  ;;  %v46_v28 = vld [vmem:[%s2952_s1 + $0xa8] sm:$0xff] }
   0xa   :  { %1105 = vperm.xlu2 %1473, %v1079_v22   ;;  %v33_v27 = vld [vmem:[%s2952_s1 + $0x40] sm:$0xff]  ;;  %v1092_v29 = vld [vmem:[%s2954_s0 + $0x68] sm:$0xff]  ;;  %v254_v32 = vld [vmem:[%s2955_s4 + $0x18] sm:$0xff] }
   0xb   :  { %v1080_v30 = vld [vmem:[%s2954_s0 + $0x8] sm:$0xff]  ;;  %v1083_v31 = vld [vmem:[%s2954_s0 + $0x20] sm:$0xff]  ;;  %346 = vmatpush.msra.mxu1 %v254_v32  ;;  %1467 = vmatpush.msra.mxu3 %v254_v32  ;;  %v47_v34 = vld [vmem:[%s2952_s1 + $0xb0] sm:$0xff] }
   0xc   :  { %1108 = vperm.xlu0 %1474, %v1080_v30   ;;  %v34_v33 = vld [vmem:[%s2952_s1 + $0x48] sm:$0xff]  ;;  %v1095_v35 = vld [vmem:[%s2954_s0 + $0x80] sm:$0xff]  ;;  %v1085_v37 = vld [vmem:[%s2954_s0 + $0x30] sm:$0xff] }
   0xd   :  { %v1087_v36 = vld [vmem:[%s2954_s0 + $0x40] sm:$0xff]  ;;  %v35_v38 = vld [vmem:[%s2952_s1 + $0x50] sm:$0xff]  ;;  %v48_v39 = vld [vmem:[%s2952_s1 + $0xb8] sm:$0xff] }
   0xe   :  { %v1098_v40 = vld [vmem:[%s2954_s0 + $0x98] sm:$0xff]  ;;  %v1088_v42 = vld [vmem:[%s2954_s0 + $0x48] sm:$0xff]  ;;  %v49_v44 = vld [vmem:[%s2952_s1 + $0xc0] sm:$0xff] }
   0xf   :  { %1120 = vperm.xlu1 %1475, %v1084_v18   ;;  %v1090_v41 = vld [vmem:[%s2954_s0 + $0x58] sm:$0xff]  ;;  %v1101_v45 = vld [vmem:[%s2954_s0 + $0xb0] sm:$0xff]  ;;  %v37_v48 = vld [vmem:[%s2952_s1 + $0x60] sm:$0xff] }
  0x10   :  { %v36_v43 = vld [vmem:[%s2952_s1 + $0x58] sm:$0xff]  ;;  %v1093_v46 = vld [vmem:[%s2954_s0 + $0x70] sm:$0xff]  ;;  %v252_v49 = vld [vmem:[%s2955_s4 + $0x8] sm:$0xff] }
  0x11   :  { %1389 = vmatmul.msk.f32.gmra.mxu0 %vm58_vm0, %v26_v6  ;;  %1402 = vmatmul.msk.f32.gmra.mxu2 %vm58_vm0, %v39_v7  ;;  %v253_v47 = vld [vmem:[%s2955_s4 + $0x10] sm:$0xff]  ;;  %v1091_v50 = vld [vmem:[%s2954_s0 + $0x60] sm:$0xff]  ;;  %v1096_v52 = vld [vmem:[%s2954_s0 + $0x88] sm:$0xff] }
  0x12   :  { %1114 = vperm.xlu2 %1473, %v1082_v26   ;;  %347 = vmatpush.msra.mxu1 %v253_v47  ;;  %v251_v51 = vld [vmem:[%s2955_s4] sm:$0xff]  ;;  %v1094_v53 = vld [vmem:[%s2954_s0 + $0x78] sm:$0xff]  ;;  %v1097_v55 = vld [vmem:[%s2954_s0 + $0x90] sm:$0xff] }
  0x13   :  { %1468 = vmatpush.msra.mxu3 %v253_v47  ;;  %v1099_v54 = vld [vmem:[%s2954_s0 + $0xa0] sm:$0xff]  ;;  %v1102_v56 = vld [vmem:[%s2954_s0 + $0xb8] sm:$0xff]  ;;  %v1100_v57 = vld [vmem:[%s2954_s0 + $0xa8] sm:$0xff] }
  0x14   :  { %1129 = vperm.xlu0 %1474, %v1087_v36   ;;  %348 = vmatpush.msra.mxu1 %v252_v49  ;;  %v1869_v58 = vld [vmem:[%s2953_s3] ss:$0 sm:$0xff] }
  0x15   :  { %1469 = vmatpush.msra.mxu3 %v252_v49  ;;  %v1103_v61 = vld [vmem:[%s2954_s0 + $0xc0] sm:$0xff] }
  0x16   :  { %349 = vmatpush.msra.mxu1 %v251_v51 }
  0x17   :  { %1126 = vperm.xlu1 %1475, %v1086_v21   ;;  %1470 = vmatpush.msra.mxu3 %v251_v51 }
  0x19   :  { %1390 = vmatmul.msk.f32.gmra.mxu0 %vm58_vm0, %v27_v8  ;;  %1403 = vmatmul.msk.f32.gmra.mxu2 %vm58_vm0, %v40_v9 }
  0x1a   :  { %1117 = vperm.xlu2 %1473, %v1083_v31  }
  0x1c   :  { %1138 = vperm.xlu0 %1474, %v1090_v41  }
  0x1f   :  { %1135 = vperm.xlu1 %1475, %v1089_v25  }
  0x21   :  { %1391 = vmatmul.msk.f32.gmra.mxu0 %vm58_vm0, %v28_v10  ;;  %1404 = vmatmul.msk.f32.gmra.mxu2 %vm58_vm0, %v41_v11 }
  0x22   :  { %1123 = vperm.xlu2 %1473, %v1085_v37  }
  0x24   :  { %1147 = vperm.xlu0 %1474, %v1093_v46  }
  0x27   :  { %1144 = vperm.xlu1 %1475, %v1092_v29  }
  0x29   :  { %1392 = vmatmul.msk.f32.gmra.mxu0 %vm58_vm0, %v29_v13  ;;  %1405 = vmatmul.msk.f32.gmra.mxu2 %vm58_vm0, %v42_v14 }
  0x2a   :  { %1132 = vperm.xlu2 %1473, %v1088_v42  }
  0x2c   :  { %1156 = vperm.xlu0 %1474, %v1096_v52  }
  0x2f   :  { %1153 = vperm.xlu1 %1475, %v1095_v35  }
  0x31   :  { %1393 = vmatmul.msk.f32.gmra.mxu0 %vm58_vm0, %v30_v16  ;;  %1406 = vmatmul.msk.f32.gmra.mxu2 %vm58_vm0, %v43_v17 }
  0x32   :  { %1141 = vperm.xlu2 %1473, %v1091_v50  }
  0x34   :  { %1165 = vperm.xlu0 %1474, %v1099_v54  }
  0x37   :  { %1162 = vperm.xlu1 %1475, %v1098_v40  }
  0x39   :  { %1394 = vmatmul.msk.f32.gmra.mxu0 %vm58_vm0, %v31_v19  ;;  %1407 = vmatmul.msk.f32.gmra.mxu2 %vm58_vm0, %v44_v20 }
  0x3a   :  { %1150 = vperm.xlu2 %1473, %v1094_v53  }
  0x3c   :  { %1174 = vperm.xlu0 %1474, %v1102_v56  }
  0x3f   :  { %1171 = vperm.xlu1 %1475, %v1101_v45  }
  0x41   :  { %1395 = vmatmul.msk.f32.gmra.mxu0 %vm58_vm0, %v32_v23  ;;  %1408 = vmatmul.msk.f32.gmra.mxu2 %vm58_vm0, %v45_v24 }
  0x42   :  { %1159 = vperm.xlu2 %1473, %v1097_v55  }
  0x49   :  { %1396 = vmatmul.msk.f32.gmra.mxu0 %vm58_vm0, %v33_v27  ;;  %1409 = vmatmul.msk.f32.gmra.mxu2 %vm58_vm0, %v46_v28 }
  0x4a   :  { %1168 = vperm.xlu2 %1473, %v1100_v57  }
  0x51   :  { %1397 = vmatmul.msk.f32.gmra.mxu0 %vm58_vm0, %v34_v33  ;;  %1410 = vmatmul.msk.f32.gmra.mxu2 %vm58_vm0, %v47_v34 }
  0x52   :  { %1177 = vperm.xlu2 %1473, %v1103_v61  }
  0x59   :  { %1398 = vmatmul.msk.f32.gmra.mxu0 %vm58_vm0, %v35_v38  ;;  %1411 = vmatmul.msk.f32.gmra.mxu2 %vm58_vm0, %v48_v39 }
  0x61   :  { %1399 = vmatmul.msk.f32.gmra.mxu0 %vm58_vm0, %v36_v43  ;;  %1412 = vmatmul.msk.f32.gmra.mxu2 %vm58_vm0, %v49_v44 }
  0x69   :  { %1400 = vmatmul.msk.f32.gmra.mxu0 %vm58_vm0, %v37_v48 }
  0x86   :  { %v151_v59 = vpop.f32.mrf.mxu0 }
  0x87   :  { %v152_v60 = vadd.f32 %v1869_v58, %v151_v59 }
  0x89   :  { %v226_v62 = vmax.f32 %v152_v60, 0.0 }
  0x8b   :  { %1413 = vmatmul.msk.f32.vlgmr.msra.gmra.mxu1 %vm58_vm0, %v226_v62 }
  0x8c   :  { %v190_v63 = vpop.f32.mrf.mxu2 }
  0x8d   :  { %v191_v0 = vadd.f32 %v1869_v58, %v190_v63 }
  0x8e   :  { %v154_v1 = vpop.f32.mrf.mxu0 }
  0x8f   :  { %v239_v2 = vmax.f32 %v191_v0, 0.0  ;;  %v155_v3 = vadd.f32 %v1869_v58, %v154_v1 }
  0x91   :  { %v227_v4 = vmax.f32 %v155_v3, 0.0  ;;  %1426 = vmatmul.msk.f32.vlgmr.msra.gmra.mxu3 %vm58_vm0, %v239_v2 }
  0x93   :  { %1414 = vmatmul.msk.f32.gmra.mxu1 %vm58_vm0, %v227_v4 }
  0x94   :  { %v193_v5 = vpop.f32.mrf.mxu2 }
  0x95   :  { %v194_v6 = vadd.f32 %v1869_v58, %v193_v5 }
  0x96   :  { %v157_v7 = vpop.f32.mrf.mxu0 }
  0x97   :  { %v240_v8 = vmax.f32 %v194_v6, 0.0  ;;  %v158_v9 = vadd.f32 %v1869_v58, %v157_v7  ;;  %v1112_v7 = vpop.permute.xlu1 %1111 }
  0x99   :  { %v228_v10 = vmax.f32 %v158_v9, 0.0  ;;  %1427 = vmatmul.msk.f32.gmra.mxu3 %vm58_vm0, %v240_v8  ;;  %v1106_v9 = vpop.permute.xlu2 %1105 }
  0x9b   :  { %1415 = vmatmul.msk.f32.gmra.mxu1 %vm58_vm0, %v228_v10 }
  0x9c   :  { %v196_v11 = vpop.f32.mrf.mxu2 }
  0x9d   :  { %v197_v12 = vadd.f32 %v1869_v58, %v196_v11 }
  0x9e   :  { %v160_v13 = vpop.f32.mrf.mxu0 }
  0x9f   :  { %v241_v14 = vmax.f32 %v197_v12, 0.0  ;;  %v161_v15 = vadd.f32 %v1869_v58, %v160_v13  ;;  %v1924_v10 = vpop.permute.xlu1 %1120  ;;  %v1109_v13 = vpop.permute.xlu0 %1108 }
  0xa1   :  { %v229_v16 = vmax.f32 %v161_v15, 0.0  ;;  %1428 = vmatmul.msk.f32.gmra.mxu3 %vm58_vm0, %v241_v14  ;;  %v1115_v11 = vpop.permute.xlu2 %1114  ;;  %v1077_v14 = vlaneseq }
  0xa3   :  { %1416 = vmatmul.msk.f32.gmra.mxu1 %vm58_vm0, %v229_v16  ;;  %v1928_v15 = vand.u32 127, %v1077_v14 }
  0xa4   :  { %v199_v17 = vpop.f32.mrf.mxu2 }
  0xa5   :  { %v200_v18 = vadd.f32 %v1869_v58, %v199_v17  ;;  %vm1179_vm1 = vcmp.eq.s32.totalorder %v1928_v15, %v1106_v9  ;;  %vm1180_vm3 = vcmp.eq.s32.totalorder %v1928_v15, %v1109_v13  ;;  %vm1181_vm4 = vcmp.eq.s32.totalorder %v1928_v15, %v1112_v7 }
  0xa6   :  { %v163_v19 = vpop.f32.mrf.mxu0  ;;  %vm1182_vm6 = vcmp.eq.s32.totalorder %v1928_v15, %v1115_v11  ;;  %vm1184_vm7 = vcmp.eq.s32.totalorder %v1928_v15, %v1924_v10 }
  0xa7   :  { %v242_v20 = vmax.f32 %v200_v18, 0.0  ;;  %v164_v21 = vadd.f32 %v1869_v58, %v163_v19  ;;  %v1926_v12 = vpop.permute.xlu1 %1126  ;;  %v1940_v18 = vpop.permute.xlu0 %1129 }
  0xa8   :  { %vm1187_vm11 = vcmp.eq.s32.totalorder %v1928_v15, %v1940_v18  ;;  %vm1186_vm12 = vcmp.eq.s32.totalorder %v1928_v15, %v1926_v12 }
  0xa9   :  { %v230_v22 = vmax.f32 %v164_v21, 0.0  ;;  %1429 = vmatmul.msk.f32.gmra.mxu3 %vm58_vm0, %v242_v20  ;;  %v1936_v16 = vpop.permute.xlu2 %1117  ;;  %v2959_v21 = vmov 0.0  }
  0xaa   :  { %vm1183_vm9 = vcmp.eq.s32.totalorder %v1928_v15, %v1936_v16  ;;  %v1446_v16 = vsel %vm1187_vm11, 1.0, %v2959_v21 }
  0xab   :  { %1417 = vmatmul.msk.f32.gmra.mxu1 %vm58_vm0, %v230_v22  ;;  %v1438_v22 = vsel %vm1179_vm1, 1.0, %v2959_v21 }
  0xac   :  { %v202_v23 = vpop.f32.mrf.mxu2 }
  0xad   :  { %v203_v24 = vadd.f32 %v1869_v58, %v202_v23 }
  0xae   :  { %v166_v25 = vpop.f32.mrf.mxu0 }
  0xaf   :  { %v243_v26 = vmax.f32 %v203_v24, 0.0  ;;  %v167_v27 = vadd.f32 %v1869_v58, %v166_v25  ;;  %v1938_v17 = vpop.permute.xlu1 %1135 }
  0xb0   :  { %vm1189_vm15 = vcmp.eq.s32.totalorder %v1928_v15, %v1938_v17 }
  0xb1   :  { %v231_v28 = vmax.f32 %v167_v27, 0.0  ;;  %1430 = vmatmul.msk.f32.gmra.mxu3 %vm58_vm0, %v243_v26  ;;  %v1948_v25 = vpop.permute.xlu2 %1123 }
  0xb2   :  { %vm1185_vm10 = vcmp.eq.s32.totalorder %v1928_v15, %v1948_v25 }
  0xb3   :  { %1418 = vmatmul.msk.f32.gmra.mxu1 %vm58_vm0, %v231_v28  ;;  %v1953_v28 = vpop.permute.xlu0 %1138 }
  0xb4   :  { %v205_v29 = vpop.f32.mrf.mxu2  ;;  %vm1190_vm14 = vcmp.eq.s32.totalorder %v1928_v15, %v1953_v28 }
  0xb5   :  { %v206_v30 = vadd.f32 %v1869_v58, %v205_v29 }
  0xb6   :  { %v169_v31 = vpop.f32.mrf.mxu0 }
  0xb7   :  { %v244_v32 = vmax.f32 %v206_v30, 0.0  ;;  %v170_v33 = vadd.f32 %v1869_v58, %v169_v31  ;;  %v1145_v27 = vpop.permute.xlu1 %1144 }
  0xb8   :  { %vm1192_vm2 = vcmp.eq.s32.totalorder %v1928_v15, %v1145_v27 }
  0xb9   :  { %v232_v34 = vmax.f32 %v170_v33, 0.0  ;;  %1431 = vmatmul.msk.f32.gmra.mxu3 %vm58_vm0, %v244_v32  ;;  %v1451_v31 = vsel %vm1192_vm2, 1.0, %v2959_v21  ;;  %v1439_v33 = vsel %vm1180_vm3, 1.0, %v2959_v21 }
  0xbb   :  { %1419 = vmatmul.msk.f32.gmra.mxu1 %vm58_vm0, %v232_v34 }
  0xbc   :  { %v208_v35 = vpop.f32.mrf.mxu2 }
  0xbd   :  { %v209_v36 = vadd.f32 %v1869_v58, %v208_v35 }
  0xbe   :  { %v172_v37 = vpop.f32.mrf.mxu0 }
  0xbf   :  { %v245_v38 = vmax.f32 %v209_v36, 0.0  ;;  %v173_v39 = vadd.f32 %v1869_v58, %v172_v37  ;;  %v1967_v36 = vpop.permute.xlu2 %1132 }
  0xc0   :  { %vm1188_vm13 = vcmp.eq.s32.totalorder %v1928_v15, %v1967_v36 }
  0xc1   :  { %v233_v40 = vmax.f32 %v173_v39, 0.0  ;;  %1432 = vmatmul.msk.f32.gmra.mxu3 %vm58_vm0, %v245_v38  ;;  %v1148_v38 = vpop.permute.xlu0 %1147 }
  0xc2   :  { %vm1193_vm5 = vcmp.eq.s32.totalorder %v1928_v15, %v1148_v38 }
  0xc3   :  { %1420 = vmatmul.msk.f32.gmra.mxu1 %vm58_vm0, %v233_v40 }
  0xc4   :  { %v211_v41 = vpop.f32.mrf.mxu2 }
  0xc5   :  { %v212_v42 = vadd.f32 %v1869_v58, %v211_v41  ;;  %v1440_v41 = vsel %vm1181_vm4, 1.0, %v2959_v21 }
  0xc6   :  { %v175_v43 = vpop.f32.mrf.mxu0 }
  0xc7   :  { %v246_v44 = vmax.f32 %v212_v42, 0.0  ;;  %v176_v45 = vadd.f32 %v1869_v58, %v175_v43  ;;  %v1452_v43 = vsel %vm1193_vm5, 1.0, %v2959_v21 }
  0xc9   :  { %v234_v46 = vmax.f32 %v176_v45, 0.0  ;;  %1433 = vmatmul.msk.f32.gmra.mxu3 %vm58_vm0, %v246_v44 }
  0xcb   :  { %1421 = vmatmul.msk.f32.gmra.mxu1 %vm58_vm0, %v234_v46 }
  0xcc   :  { %v214_v47 = vpop.f32.mrf.mxu2 }
  0xcd   :  { %v215_v48 = vadd.f32 %v1869_v58, %v214_v47 }
  0xce   :  { %v178_v49 = vpop.f32.mrf.mxu0 }
  0xcf   :  { %v247_v50 = vmax.f32 %v215_v48, 0.0  ;;  %v179_v51 = vadd.f32 %v1869_v58, %v178_v49  ;;  %v1984_v48 = vpop.permute.xlu2 %1141 }
  0xd1   :  { %v235_v52 = vmax.f32 %v179_v51, 0.0  ;;  %1434 = vmatmul.msk.f32.gmra.mxu3 %vm58_vm0, %v247_v50  ;;  %v1441_v51 = vsel %vm1182_vm6, 1.0, %v2959_v21 }
  0xd3   :  { %1422 = vmatmul.msk.f32.gmra.mxu1 %vm58_vm0, %v235_v52 }
  0xd4   :  { %v217_v53 = vpop.f32.mrf.mxu2 }
  0xd5   :  { %v218_v54 = vadd.f32 %v1869_v58, %v217_v53 }
  0xd6   :  { %v181_v55 = vpop.f32.mrf.mxu0 }
  0xd7   :  { %v248_v56 = vmax.f32 %v218_v54, 0.0  ;;  %v182_v57 = vadd.f32 %v1869_v58, %v181_v55  ;;  %v1151_v55 = vpop.permute.xlu2 %1150 }
  0xd8   :  { %vm1194_vm8 = vcmp.eq.s32.totalorder %v1928_v15, %v1151_v55 }
  0xd9   :  { %v236_v59 = vmax.f32 %v182_v57, 0.0  ;;  %1435 = vmatmul.msk.f32.gmra.mxu3 %vm58_vm0, %v248_v56 }
  0xdb   :  { %1423 = vmatmul.msk.f32.gmra.mxu1 %vm58_vm0, %v236_v59  ;;  %v1443_v59 = vsel %vm1184_vm7, 1.0, %v2959_v21 }
  0xdc   :  { %v220_v60 = vpop.f32.mrf.mxu2 }
  0xdd   :  { %v221_v61 = vadd.f32 %v1869_v58, %v220_v60 }
  0xde   :  { %v184_v62 = vpop.f32.mrf.mxu0 }
  0xdf   :  { %v249_v63 = vmax.f32 %v221_v61, 0.0  ;;  %v185_v0 = vadd.f32 %v1869_v58, %v184_v62  ;;  %v1453_v61 = vsel %vm1194_vm8, 1.0, %v2959_v21 }
  0xe1   :  { %v237_v1 = vmax.f32 %v185_v0, 0.0  ;;  %1436 = vmatmul.msk.f32.gmra.mxu3 %vm58_vm0, %v249_v63  ;;  %v1442_v0 = vsel %vm1183_vm9, 1.0, %v2959_v21 }
  0xe3   :  { %1424 = vmatmul.msk.f32.gmra.mxu1 %vm58_vm0, %v237_v1 }
  0xe4   :  { %v223_v2 = vpop.f32.mrf.mxu2 }
  0xe5   :  { %v224_v3 = vadd.f32 %v1869_v58, %v223_v2 }
  0xe6   :  { %v187_v4 = vpop.f32.mrf.mxu0 }
  0xe7   :  { %v250_v5 = vmax.f32 %v224_v3, 0.0  ;;  %v188_v6 = vadd.f32 %v1869_v58, %v187_v4  ;;  %v1933_v58 = vld [vmem:[%s2956_s5] ss:$0 sm:$0xff] }
  0xe9   :  { %v238_v8 = vmax.f32 %v188_v6, 0.0  ;;  %1437 = vmatmul.msk.f32.gmra.mxu3 %vm58_vm0, %v250_v5 }
  0xeb   :  { %1425 = vmatmul.msk.f32.gmra.mxu1 %vm58_vm0, %v238_v8  ;;  %v1444_v8 = vsel %vm1185_vm10, 1.0, %v2959_v21  ;;  %vm1191_vm0 = vcmp.eq.s32.totalorder %v1928_v15, %v1984_v48  ;;  %vm1354_vm10 = vcmask 7168  }
 0x108   :  { %v351_v19 = vpop.f32.mrf.mxu1 }
 0x109   :  { %v1943_v20 = vadd.f32 %v1933_v58, %v351_v19 }
 0x10b   :  { %426 = vmax.xlane.f32.xlu0 %v1943_v20  ;;  %v1254_v23 = vmul.f32 %v1438_v22, %v1943_v20 }
 0x10d   :  { %1279 = vadd.xlane.f32.xlu1 %v1254_v23  ;;  %v1445_v23 = vsel %vm1186_vm12, 1.0, %v2959_v21 }
 0x110   :  { %v354_v24 = vpop.f32.mrf.mxu1 }
 0x111   :  { %v1951_v26 = vadd.f32 %v1933_v58, %v354_v24 }
 0x113   :  { %428 = vmax.xlane.f32.xlu0 %v1951_v26  ;;  %v1255_v35 = vmul.f32 %v1439_v33, %v1951_v26  ;;  %v1447_v33 = vsel %vm1188_vm13, 1.0, %v2959_v21 }
 0x114   :  { %v390_v29 = vpop.f32.mrf.mxu3 }
 0x115   :  { %v1959_v30 = vadd.f32 %v1933_v58, %v390_v29 }
 0x117   :  { %452 = vmax.xlane.f32.xlu1 %v1959_v30  ;;  %v1267_v32 = vmul.f32 %v1451_v31, %v1959_v30 }
 0x118   :  { %v357_v34 = vpop.f32.mrf.mxu1 }
 0x119   :  { %1305 = vadd.xlane.f32.xlu2 %v1267_v32  ;;  %v1970_v37 = vadd.f32 %v1933_v58, %v357_v34 }
 0x11b   :  { %1281 = vadd.xlane.f32.xlu0 %v1255_v35  ;;  %v1256_v42 = vmul.f32 %v1440_v41, %v1970_v37  ;;  %v1449_v41 = vsel %vm1190_vm14, 1.0, %v2959_v21 }
 0x11c   :  { %v393_v39 = vpop.f32.mrf.mxu3 }
 0x11d   :  { %v1974_v40 = vadd.f32 %v1933_v58, %v393_v39 }
 0x11f   :  { %430 = vmax.xlane.f32.xlu1 %v1970_v37  ;;  %v1268_v45 = vmul.f32 %v1452_v43, %v1974_v40 }
 0x120   :  { %v360_v44 = vpop.f32.mrf.mxu1 }
 0x121   :  { %1283 = vadd.xlane.f32.xlu2 %v1256_v42  ;;  %v1982_v47 = vadd.f32 %v1933_v58, %v360_v44  ;;  %v2076_v42 = vpop.permute.xlu0 %1156  ;;  %v2084_v44 = vpop.permute.xlu1 %1153 }
 0x122   :  { %vm1195_vm1 = vcmp.eq.s32.totalorder %v1928_v15, %v2084_v44  ;;  %vm1196_vm4 = vcmp.eq.s32.totalorder %v1928_v15, %v2076_v42 }
 0x123   :  { %1307 = vadd.xlane.f32.xlu0 %v1268_v45  ;;  %v1257_v53 = vmul.f32 %v1441_v51, %v1982_v47  ;;  %v1448_v45 = vsel %vm1189_vm15, 1.0, %v2959_v21  ;;  %vm976_vm15 = vcmask 15360  }
 0x124   :  { %v396_v46 = vpop.f32.mrf.mxu3 }
 0x125   :  { %v1989_v50 = vadd.f32 %v1933_v58, %v396_v46 }
 0x127   :  { %432 = vmax.xlane.f32.xlu1 %v1982_v47  ;;  %v1269_v63 = vmul.f32 %v1453_v61, %v1989_v50  ;;  %v1450_v61 = vsel %vm1191_vm0, 1.0, %v2959_v21 }
 0x128   :  { %v363_v49 = vpop.f32.mrf.mxu1 }
 0x129   :  { %454 = vmax.xlane.f32.xlu2 %v1974_v40  ;;  %v1998_v54 = vadd.f32 %v1933_v58, %v363_v49  ;;  %v2092_v17 = vpop.permute.xlu0 %1165  ;;  %v2098_v55 = vpop.permute.xlu1 %1162 }
 0x12a   :  { %vm1198_vm3 = vcmp.eq.s32.totalorder %v1928_v15, %v2098_v55  ;;  %vm1199_vm7 = vcmp.eq.s32.totalorder %v1928_v15, %v2092_v17 }
 0x12b   :  { %456 = vmax.xlane.f32.xlu0 %v1989_v50  ;;  %v1258_v1 = vmul.f32 %v1442_v0, %v1998_v54 }
 0x12c   :  { %v399_v52 = vpop.f32.mrf.mxu3 }
 0x12d   :  { %v2017_v5 = vadd.f32 %v1933_v58, %v399_v52 }
 0x12f   :  { %1285 = vadd.xlane.f32.xlu1 %v1257_v53 }
 0x130   :  { %v366_v56 = vpop.f32.mrf.mxu1 }
 0x131   :  { %v2002_v57 = vadd.f32 %v1933_v58, %v366_v56  ;;  %434 = vmax.xlane.f32.xlu2 %v1998_v54  ;;  %v2101_v56 = vpop.permute.xlu2 %1159  ;;  %v2118_v48 = vpop.permute.xlu1 %1171 }
 0x132   :  { %vm1197_vm2 = vcmp.eq.s32.totalorder %v1928_v15, %v2101_v56  ;;  %vm1201_vm6 = vcmp.eq.s32.totalorder %v1928_v15, %v2118_v48 }
 0x133   :  { %v1259_v60 = vmul.f32 %v1443_v59, %v2002_v57 }
 0x134   :  { %v402_v62 = vpop.f32.mrf.mxu3 }
 0x135   :  { %1289 = vadd.xlane.f32.xlu0 %v1259_v60  ;;  %v2033_v11 = vadd.f32 %v1933_v58, %v402_v62 }
 0x137   :  { %1309 = vadd.xlane.f32.xlu1 %v1269_v63  ;;  %v2112_v63 = vpop.permute.xlu0 %1174 }
 0x138   :  { %v369_v2 = vpop.f32.mrf.mxu1  ;;  %vm1202_vm9 = vcmp.eq.s32.totalorder %v1928_v15, %v2112_v63 }
 0x139   :  { %1287 = vadd.xlane.f32.xlu2 %v1258_v1  ;;  %v2014_v3 = vadd.f32 %v1933_v58, %v369_v2  ;;  %v2120_v1 = vpop.permute.xlu2 %1168 }
 0x13a   :  { %vm1200_vm5 = vcmp.eq.s32.totalorder %v1928_v15, %v2120_v1 }
 0x13b   :  { %v1260_v10 = vmul.f32 %v1444_v8, %v2014_v3 }
 0x13c   :  { %v405_v4 = vpop.f32.mrf.mxu3 }
 0x13d   :  { %438 = vmax.xlane.f32.xlu0 %v2014_v3  ;;  %v2025_v7 = vadd.f32 %v1933_v58, %v405_v4 }
 0x13f   :  { %458 = vmax.xlane.f32.xlu1 %v2017_v5 }
 0x140   :  { %v372_v6 = vpop.f32.mrf.mxu1 }
 0x141   :  { %436 = vmax.xlane.f32.xlu2 %v2002_v57  ;;  %v2043_v19 = vadd.f32 %v1933_v58, %v372_v6 }
 0x143   :  { %v1261_v24 = vmul.f32 %v1445_v23, %v2043_v19 }
 0x144   :  { %v408_v9 = vpop.f32.mrf.mxu3 }
 0x145   :  { %462 = vmax.xlane.f32.xlu0 %v2025_v7  ;;  %v2053_v12 = vadd.f32 %v1933_v58, %v408_v9  ;;  %v2128_v9 = vpop.permute.xlu2 %1177 }
 0x146   :  { %vm1203_vm8 = vcmp.eq.s32.totalorder %v1928_v15, %v2128_v9 }
 0x147   :  { %1291 = vadd.xlane.f32.xlu1 %v1260_v10 }
 0x148   :  { %v375_v13 = vpop.f32.mrf.mxu1 }
 0x149   :  { %v2036_v14 = vadd.f32 %v1933_v58, %v375_v13  ;;  %460 = vmax.xlane.f32.xlu2 %v2033_v11 }
 0x14b   :  { %v1262_v18 = vmul.f32 %v1446_v16, %v2036_v14 }
 0x14c   :  { %v411_v22 = vpop.f32.mrf.mxu3 }
 0x14d   :  { %1295 = vadd.xlane.f32.xlu0 %v1262_v18  ;;  %v2069_v38 = vadd.f32 %v1933_v58, %v411_v22 }
 0x14f   :  { %440 = vmax.xlane.f32.xlu1 %v2043_v19 }
 0x150   :  { %v378_v25 = vpop.f32.mrf.mxu1 }
 0x151   :  { %1293 = vadd.xlane.f32.xlu2 %v1261_v24  ;;  %v2050_v27 = vadd.f32 %v1933_v58, %v378_v25 }
 0x153   :  { %v1263_v35 = vmul.f32 %v1447_v33, %v2050_v27 }
 0x154   :  { %v414_v29 = vpop.f32.mrf.mxu3 }
 0x155   :  { %444 = vmax.xlane.f32.xlu0 %v2050_v27  ;;  %v2061_v32 = vadd.f32 %v1933_v58, %v414_v29 }
 0x157   :  { %464 = vmax.xlane.f32.xlu1 %v2053_v12 }
 0x158   :  { %v381_v31 = vpop.f32.mrf.mxu1 }
 0x159   :  { %442 = vmax.xlane.f32.xlu2 %v2036_v14  ;;  %v2081_v43 = vadd.f32 %v1933_v58, %v381_v31 }
 0x15b   :  { %v1264_v49 = vmul.f32 %v1448_v45, %v2081_v43 }
 0x15c   :  { %v417_v34 = vpop.f32.mrf.mxu3 }
 0x15d   :  { %468 = vmax.xlane.f32.xlu0 %v2061_v32  ;;  %v2095_v53 = vadd.f32 %v1933_v58, %v417_v34 }
 0x15f   :  { %1297 = vadd.xlane.f32.xlu1 %v1263_v35 }
 0x160   :  { %v384_v36 = vpop.f32.mrf.mxu1 }
 0x161   :  { %v2072_v39 = vadd.f32 %v1933_v58, %v384_v36  ;;  %466 = vmax.xlane.f32.xlu2 %v2069_v38 }
 0x163   :  { %v1265_v28 = vmul.f32 %v1449_v41, %v2072_v39 }
 0x164   :  { %v420_v46 = vpop.f32.mrf.mxu3 }
 0x165   :  { %1301 = vadd.xlane.f32.xlu0 %v1265_v28  ;;  %v2115_v0 = vadd.f32 %v1933_v58, %v420_v46 }
 0x167   :  { %446 = vmax.xlane.f32.xlu1 %v2081_v43 }
 0x168   :  { %v387_v51 = vpop.f32.mrf.mxu1 }
 0x169   :  { %1299 = vadd.xlane.f32.xlu2 %v1264_v49  ;;  %v2090_v52 = vadd.f32 %v1933_v58, %v387_v51 }
 0x16b   :  { %v1266_v62 = vmul.f32 %v1450_v61, %v2090_v52 }
 0x16c   :  { %v423_v59 = vpop.f32.mrf.mxu3 }
 0x16d   :  { %450 = vmax.xlane.f32.xlu0 %v2090_v52  ;;  %v2107_v60 = vadd.f32 %v1933_v58, %v423_v59 }
 0x16f   :  { %470 = vmax.xlane.f32.xlu1 %v2095_v53 }
 0x171   :  { %448 = vmax.xlane.f32.xlu2 %v2072_v39 }
 0x175   :  { %474 = vmax.xlane.f32.xlu0 %v2107_v60 }
 0x177   :  { %1303 = vadd.xlane.f32.xlu1 %v1266_v62 }
 0x179   :  { %472 = vmax.xlane.f32.xlu2 %v2115_v0 }
 0x17e   :  { %v2122_v2 = vpop.xlane.xlu0 %426 }
 0x17f   :  { %v476_v4 = vsub.f32 %v1943_v20, %v2122_v2 }
 0x180   :  { %v2126_v8 = vpop.xlane.xlu1 %1279 }
 0x181   :  { %v501_v6 = vmul.f32 1.442695, %v476_v4 }
 0x183   :  { %1478 = vpow2.f32 %v501_v6 }
 0x186   :  { %v2130_v58 = vpop.xlane.xlu0 %428 }
 0x187   :  { %v477_v10 = vsub.f32 %v1951_v26, %v2130_v58 }
 0x189   :  { %v2134_v13 = vpop.eup %1478  ;;  %v503_v16 = vmul.f32 1.442695, %v477_v10 }
 0x18a   :  { %v2136_v18 = vpop.xlane.xlu1 %452  ;;  %551 = vadd.xlane.f32.xlu1 %v2134_v13 }
 0x18b   :  { %1480 = vpow2.f32 %v503_v16  ;;  %v489_v20 = vsub.f32 %v1959_v30, %v2136_v18 }
 0x18c   :  { %v2141_v22 = vpop.xlane.xlu2 %1305 }
 0x18d   :  { %v527_v24 = vmul.f32 1.442695, %v489_v20 }
 0x18e   :  { %v2143_v23 = vpop.xlane.xlu0 %1281 }
 0x18f   :  { %1482 = vpow2.f32 %v527_v24 }
 0x191   :  { %v2145_v25 = vpop.eup %1480 }
 0x192   :  { %v2147_v29 = vpop.xlane.xlu1 %430  ;;  %553 = vadd.xlane.f32.xlu2 %v2145_v25 }
 0x193   :  { %v478_v26 = vsub.f32 %v1970_v37, %v2147_v29 }
 0x194   :  { %v2152_v31 = vpop.xlane.xlu2 %1283 }
 0x195   :  { %v505_v33 = vmul.f32 1.442695, %v478_v26  ;;  %v2156_v30 = vpop.eup %1482 }
 0x196   :  { %v2154_v34 = vpop.xlane.xlu0 %1307 }
 0x197   :  { %1484 = vpow2.f32 %v505_v33 }
 0x19a   :  { %v2158_v35 = vpop.xlane.xlu1 %432  ;;  %577 = vadd.xlane.f32.xlu2 %v2156_v30 }
 0x19b   :  { %v479_v36 = vsub.f32 %v1982_v47, %v2158_v35 }
 0x19c   :  { %v2163_v41 = vpop.xlane.xlu2 %454 }
 0x19d   :  { %v2165_v28 = vpop.eup %1484  ;;  %v507_v37 = vmul.f32 1.442695, %v479_v36  ;;  %v490_v45 = vsub.f32 %v1974_v40, %v2163_v41 }
 0x19e   :  { %v2169_v46 = vpop.xlane.xlu0 %456  ;;  %555 = vadd.xlane.f32.xlu0 %v2165_v28 }
 0x19f   :  { %1486 = vpow2.f32 %v507_v37  ;;  %v529_v49 = vmul.f32 1.442695, %v490_v45  ;;  %v491_v51 = vsub.f32 %v1989_v50, %v2169_v46 }
 0x1a1   :  { %1488 = vpow2.f32 %v529_v49  ;;  %v531_v47 = vmul.f32 1.442695, %v491_v51 }
 0x1a2   :  { %v2174_v59 = vpop.xlane.xlu1 %1285 }
 0x1a3   :  { %1490 = vpow2.f32 %v531_v47 }
 0x1a4   :  { %v2176_v61 = vpop.xlane.xlu2 %434 }
 0x1a5   :  { %v2178_v62 = vpop.eup %1486  ;;  %v480_v40 = vsub.f32 %v1998_v54, %v2176_v61 }
 0x1a6   :  { %557 = vadd.xlane.f32.xlu1 %v2178_v62 }
 0x1a7   :  { %v2183_v4 = vpop.eup %1488  ;;  %v509_v6 = vmul.f32 1.442695, %v480_v40 }
 0x1a8   :  { %v2185_v10 = vpop.xlane.xlu0 %1289  ;;  %579 = vadd.xlane.f32.xlu0 %v2183_v4 }
 0x1a9   :  { %1492 = vpow2.f32 %v509_v6  ;;  %v2192_v20 = vpop.eup %1490 }
 0x1aa   :  { %v2188_v50 = vpop.xlane.xlu1 %1309 }
 0x1ac   :  { %v2190_v16 = vpop.xlane.xlu2 %1287 }
 0x1ae   :  { %581 = vadd.xlane.f32.xlu1 %v2192_v20 }
 0x1af   :  { %v2195_v54 = vpop.eup %1492 }
 0x1b0   :  { %v2197_v24 = vpop.xlane.xlu0 %438  ;;  %559 = vadd.xlane.f32.xlu2 %v2195_v54 }
 0x1b1   :  { %v482_v26 = vsub.f32 %v2014_v3, %v2197_v24 }
 0x1b2   :  { %v2202_v33 = vpop.xlane.xlu1 %458 }
 0x1b3   :  { %2982 = vst [vmem:[#allocation2_spill] sm:$0xff] %v2202_v33  ;;  %v513_v36 = vmul.f32 1.442695, %v482_v26  ;;  %v492_v37 = vsub.f32 %v2017_v5, %v2202_v33 }
 0x1b4   :  { %v2206_v45 = vpop.xlane.xlu2 %436 }
 0x1b5   :  { %1494 = vpow2.f32 %v513_v36  ;;  %v533_v49 = vmul.f32 1.442695, %v492_v37  ;;  %v481_v51 = vsub.f32 %v2002_v57, %v2206_v45 }
 0x1b7   :  { %1496 = vpow2.f32 %v533_v49  ;;  %v511_v47 = vmul.f32 1.442695, %v481_v51 }
 0x1b8   :  { %v2210_v40 = vpop.xlane.xlu0 %462 }
 0x1b9   :  { %2983 = vst [vmem:[#allocation3_spill] sm:$0xff] %v2210_v40  ;;  %1498 = vpow2.f32 %v511_v47  ;;  %v494_v3 = vsub.f32 %v2025_v7, %v2210_v40 }
 0x1ba   :  { %v2214_v6 = vpop.xlane.xlu1 %1291 }
 0x1bb   :  { %v2216_v26 = vpop.eup %1494  ;;  %v537_v21 = vmul.f32 1.442695, %v494_v3 }
 0x1bc   :  { %563 = vadd.xlane.f32.xlu1 %v2216_v26  ;;  %v2219_v36 = vpop.xlane.xlu2 %460 }
 0x1bd   :  { %2984 = vst [vmem:[#allocation4_spill] sm:$0xff] %v2219_v36  ;;  %v2221_v37 = vpop.eup %1496  ;;  %1500 = vpow2.f32 %v537_v21  ;;  %v493_v57 = vsub.f32 %v2033_v11, %v2219_v36 }
 0x1be   :  { %2985 = vst [vmem:[#allocation5_spill] sm:$0xff] %v2221_v37  ;;  %583 = vadd.xlane.f32.xlu2 %v2221_v37 }
 0x1bf   :  { %v2226_v49 = vpop.eup %1498  ;;  %v535_v51 = vmul.f32 1.442695, %v493_v57 }
 0x1c0   :  { %2986 = vst [vmem:[#allocation6_spill] sm:$0xff] %v2226_v49  ;;  %v2228_v47 = vpop.xlane.xlu0 %1295  ;;  %561 = vadd.xlane.f32.xlu0 %v2226_v49 }
 0x1c1   :  { %2987 = vst [vmem:[#allocation7_spill] sm:$0xff] %v2228_v47  ;;  %1502 = vpow2.f32 %v535_v51 }
 0x1c2   :  { %v2231_v3 = vpop.xlane.xlu1 %440 }
 0x1c3   :  { %2988 = vst [vmem:[#allocation8_spill] sm:$0xff] %v2231_v3  ;;  %v2233_v40 = vpop.eup %1500  ;;  %v483_v21 = vsub.f32 %v2043_v19, %v2231_v3 }
 0x1c4   :  { %2989 = vst [vmem:[#allocation9_spill] sm:$0xff] %v2233_v40  ;;  %587 = vadd.xlane.f32.xlu1 %v2233_v40  ;;  %v2238_v36 = vpop.xlane.xlu2 %1293 }
 0x1c5   :  { %2990 = vst [vmem:[#allocation10_spill] sm:$0xff] %v2238_v36  ;;  %v515_v33 = vmul.f32 1.442695, %v483_v21 }
 0x1c7   :  { %v2240_v37 = vpop.eup %1502  ;;  %1504 = vpow2.f32 %v515_v33 }
 0x1c8   :  { %2991 = vst [vmem:[#allocation11_spill] sm:$0xff] %v2240_v37  ;;  %v2242_v57 = vpop.xlane.xlu0 %444  ;;  %585 = vadd.xlane.f32.xlu0 %v2240_v37 }
 0x1c9   :  { %2992 = vst [vmem:[#allocation12_spill] sm:$0xff] %v2242_v57  ;;  %v485_v51 = vsub.f32 %v2050_v27, %v2242_v57 }
 0x1ca   :  { %v2247_v47 = vpop.xlane.xlu1 %464 }
 0x1cb   :  { %2993 = vst [vmem:[#allocation13_spill] sm:$0xff] %v2247_v47  ;;  %v519_v49 = vmul.f32 1.442695, %v485_v51  ;;  %v495_v19 = vsub.f32 %v2053_v12, %v2247_v47 }
 0x1cc   :  { %v2251_v3 = vpop.xlane.xlu2 %442 }
 0x1cd   :  { %2994 = vst [vmem:[#allocation14_spill] sm:$0xff] %v2251_v3  ;;  %v2253_v36 = vpop.eup %1504  ;;  %1506 = vpow2.f32 %v519_v49  ;;  %v539_v21 = vmul.f32 1.442695, %v495_v19  ;;  %v484_v33 = vsub.f32 %v2036_v14, %v2251_v3 }
 0x1ce   :  { %565 = vadd.xlane.f32.xlu2 %v2253_v36 }
 0x1cf   :  { %1508 = vpow2.f32 %v539_v21  ;;  %v517_v37 = vmul.f32 1.442695, %v484_v33 }
 0x1d0   :  { %v2258_v27 = vpop.xlane.xlu0 %468 }
 0x1d1   :  { %2995 = vst [vmem:[#allocation15_spill] sm:$0xff] %v2258_v27  ;;  %1510 = vpow2.f32 %v517_v37  ;;  %v497_v51 = vsub.f32 %v2061_v32, %v2258_v27 }
 0x1d2   :  { %v2262_v47 = vpop.xlane.xlu1 %1297 }
 0x1d3   :  { %v2264_v57 = vpop.eup %1506  ;;  %v543_v40 = vmul.f32 1.442695, %v497_v51 }
 0x1d4   :  { %569 = vadd.xlane.f32.xlu1 %v2264_v57  ;;  %v2267_v49 = vpop.xlane.xlu2 %466 }
 0x1d5   :  { %2996 = vst [vmem:[#allocation16_spill] sm:$0xff] %v2267_v49  ;;  %v2269_v14 = vpop.eup %1508  ;;  %1512 = vpow2.f32 %v543_v40  ;;  %v496_v19 = vsub.f32 %v2069_v38, %v2267_v49 }
 0x1d6   :  { %2997 = vst [vmem:[#allocation17_spill] sm:$0xff] %v2269_v14  ;;  %589 = vadd.xlane.f32.xlu2 %v2269_v14 }
 0x1d7   :  { %v2274_v37 = vpop.eup %1510  ;;  %v541_v21 = vmul.f32 1.442695, %v496_v19 }
 0x1d8   :  { %2998 = vst [vmem:[#allocation18_spill] sm:$0xff] %v2274_v37  ;;  %v2276_v33 = vpop.xlane.xlu0 %1301  ;;  %567 = vadd.xlane.f32.xlu0 %v2274_v37 }
 0x1d9   :  { %2999 = vst [vmem:[#allocation19_spill] sm:$0xff] %v2276_v33  ;;  %1514 = vpow2.f32 %v541_v21 }
 0x1da   :  { %v2279_v51 = vpop.xlane.xlu1 %446 }
 0x1db   :  { %3000 = vst [vmem:[#allocation20_spill] sm:$0xff] %v2279_v51  ;;  %v2281_v27 = vpop.eup %1512  ;;  %v486_v40 = vsub.f32 %v2081_v43, %v2279_v51 }
 0x1dc   :  { %593 = vadd.xlane.f32.xlu1 %v2281_v27  ;;  %v2286_v49 = vpop.xlane.xlu2 %1299 }
 0x1dd   :  { %3001 = vst [vmem:[#allocation21_spill] sm:$0xff] %v2286_v49  ;;  %v521_v14 = vmul.f32 1.442695, %v486_v40 }
 0x1df   :  { %v2288_v3 = vpop.eup %1514  ;;  %1516 = vpow2.f32 %v521_v14 }
 0x1e0   :  { %3002 = vst [vmem:[#allocation22_spill] sm:$0xff] %v2288_v3  ;;  %v2290_v19 = vpop.xlane.xlu0 %450  ;;  %591 = vadd.xlane.f32.xlu0 %v2288_v3 }
 0x1e1   :  { %3003 = vst [vmem:[#allocation23_spill] sm:$0xff] %v2290_v19  ;;  %v488_v21 = vsub.f32 %v2090_v52, %v2290_v19 }
 0x1e2   :  { %v2295_v33 = vpop.xlane.xlu1 %470 }
 0x1e3   :  { %3004 = vst [vmem:[#allocation24_spill] sm:$0xff] %v2295_v33  ;;  %v525_v37 = vmul.f32 1.442695, %v488_v21  ;;  %v498_v43 = vsub.f32 %v2095_v53, %v2295_v33 }
 0x1e4   :  { %v2299_v51 = vpop.xlane.xlu2 %448 }
 0x1e5   :  { %v2301_v49 = vpop.eup %1516  ;;  %1518 = vpow2.f32 %v525_v37  ;;  %v545_v40 = vmul.f32 1.442695, %v498_v43  ;;  %v487_v14 = vsub.f32 %v2072_v39, %v2299_v51 }
 0x1e6   :  { %571 = vadd.xlane.f32.xlu2 %v2301_v49 }
 0x1e7   :  { %1520 = vpow2.f32 %v545_v40  ;;  %v523_v3 = vmul.f32 1.442695, %v487_v14 }
 0x1e8   :  { %v2306_v52 = vpop.xlane.xlu0 %474 }
 0x1e9   :  { %3005 = vst [vmem:[#allocation25_spill] sm:$0xff] %v2306_v52  ;;  %1522 = vpow2.f32 %v523_v3  ;;  %v500_v21 = vsub.f32 %v2107_v60, %v2306_v52 }
 0x1eb   :  { %v2310_v33 = vpop.eup %1518  ;;  %v549_v19 = vmul.f32 1.442695, %v500_v21  ;;  %v3007_v21 = vmov 0.0  }
 0x1ec   :  { %575 = vadd.xlane.f32.xlu1 %v2310_v33  ;;  %v2313_v37 = vpop.xlane.xlu2 %472  ;;  %v1454_v52 = vsel %vm1195_vm1, 1.0, %v3007_v21  ;;  %v1456_v44 = vsel %vm1197_vm2, 1.0, %v3007_v21  ;;  %v1460_v42 = vsel %vm1201_vm6, 1.0, %v3007_v21 }
 0x1ed   :  { %3006 = vst [vmem:[#allocation26_spill] sm:$0xff] %v2313_v37  ;;  %v2315_v43 = vpop.eup %1520  ;;  %1524 = vpow2.f32 %v549_v19  ;;  %v499_v39 = vsub.f32 %v2115_v0, %v2313_v37  ;;  %v1270_v19 = vmul.f32 %v1454_v52, %v2017_v5  ;;  %v2330_v37 = vpop.xlane.xlu1 %1303  ;;  %v1272_v5 = vmul.f32 %v1456_v44, %v2025_v7 }
 0x1ee   :  { %595 = vadd.xlane.f32.xlu2 %v2315_v43  ;;  %v1457_v52 = vsel %vm1198_vm3, 1.0, %v3007_v21  ;;  %v1459_v7 = vsel %vm1200_vm5, 1.0, %v3007_v21  ;;  %v1276_v1 = vmul.f32 %v1460_v42, %v2095_v53 }
 0x1ef   :  { %v2320_v40 = vpop.eup %1522  ;;  %v547_v3 = vmul.f32 1.442695, %v499_v39  ;;  %v1273_v56 = vmul.f32 %v1457_v52, %v2053_v12  ;;  %v1275_v12 = vmul.f32 %v1459_v7, %v2061_v32 }
 0x1f0   :  { %573 = vadd.xlane.f32.xlu0 %v2320_v40 }
 0x1f1   :  { %1526 = vpow2.f32 %v547_v3  ;;  %v1455_v3 = vsel %vm1196_vm4, 1.0, %v3007_v21 }
 0x1f2   :  { %v1271_v55 = vmul.f32 %v1455_v3, %v2033_v11  ;;  %v1458_v11 = vsel %vm1199_vm7, 1.0, %v3007_v21  ;;  %v1462_v3 = vsel %vm1203_vm8, 1.0, %v3007_v21 }
 0x1f3   :  { %v2325_v14 = vpop.eup %1524  ;;  %v1274_v17 = vmul.f32 %v1458_v11, %v2069_v38  ;;  %v1278_v42 = vmul.f32 %v1462_v3, %v2107_v60 }
 0x1f4   :  { %599 = vadd.xlane.f32.xlu1 %v2325_v14 }
 0x1f6   :  { %1311 = vadd.xlane.f32.xlu2 %v1270_v19 }
 0x1f7   :  { %v2334_v39 = vpop.eup %1526 }
 0x1f8   :  { %597 = vadd.xlane.f32.xlu0 %v2334_v39 }
 0x1fc   :  { %1315 = vadd.xlane.f32.xlu1 %v1272_v5 }
 0x1fd   :  { %v552_v19 = vpop.xlane.xlu1 %551 }
 0x1fe   :  { %1528 = vrcp.f32 %v552_v19  ;;  %1317 = vadd.xlane.f32.xlu2 %v1273_v56  ;;  %v612_v53 = vand.u32 2147483648, %v552_v19  ;;  %v610_v7 = vand.u32 2147483647, %v552_v19  ;;  %vm606_vm12 = vweird.f32 %v552_v19 }
 0x1ff   :  { %1530 = vlog2.f32 %v552_v19 }
 0x200   :  { %1313 = vadd.xlane.f32.xlu0 %v1271_v55  ;;  %v613_v11 = vor.u32 1.1754944e-38, %v612_v53  ;;  %vm611_vm14 = vcmp.eq.f32.partialorder %v610_v7, 8.507059e+37 }
 0x204   :  { %v1529_v44 = vpop.eup %1528  ;;  %1321 = vadd.xlane.f32.xlu1 %v1275_v12 }
 0x205   :  { %v1531_v5 = vpop.eup %1530  ;;  %v602_v48 = vmul.f32 %v1529_v44, %v552_v19  ;;  %v554_v52 = vpop.xlane.xlu2 %553  ;;  %vm607_vm11 = vweird.f32 %v1529_v44 }
 0x206   :  { %v1003_v56 = vmul.f32 0.6931472, %v1531_v5  ;;  %1532 = vrcp.f32 %v554_v52  ;;  %1323 = vadd.xlane.f32.xlu2 %v1276_v1  ;;  %v1461_v5 = vsel %vm1202_vm9, 1.0, %v3007_v21  ;;  %vm608_vm13 = vmor %vm606_vm12, %vm607_vm11  ;;  %vm620_vm1 = vweird.f32 %v554_v52 }
 0x207   :  { %v603_v32 = vsub.f32 1.0, %v602_v48  ;;  %1534 = vlog2.f32 %v554_v52  ;;  %v1277_v60 = vmul.f32 %v1461_v5, %v2115_v0  ;;  %v624_v0 = vand.u32 2147483647, %v554_v52 }
 0x208   :  { %v1052_v55 = vadd.f32 %v1003_v56, %v2122_v2  ;;  %1319 = vadd.xlane.f32.xlu0 %v1274_v17  ;;  %v626_v17 = vand.u32 2147483648, %v554_v52 }
 0x209   :  { %v604_v9 = vmul.f32 %v1529_v44, %v603_v32  ;;  %vm625_vm3 = vcmp.eq.f32.partialorder %v624_v0, 8.507059e+37 }
 0x20a   :  { %v1329_v12 = vsub.f32 %v1052_v55, %v2126_v8 }
 0x20b   :  { %v605_v38 = vadd.f32 %v1529_v44, %v604_v9 }
 0x20c   :  { %v1533_v1 = vpop.eup %1532  ;;  %1355 = vst.msk [vmem:[%s2957_s7] sm:$0xff] %vm1354_vm10, %v1329_v12  ;;  %1327 = vadd.xlane.f32.xlu1 %v1278_v42 }
 0x20d   :  { %v1535_v15 = vpop.eup %1534  ;;  %v609_v63 = vsel %vm608_vm13, %v1529_v44, %v605_v38  ;;  %v616_v2 = vmul.f32 %v1533_v1, %v554_v52  ;;  %v578_v8 = vpop.xlane.xlu2 %577  ;;  %vm621_vm0 = vweird.f32 %v1533_v1 }
 0x20e   :  { %v614_v19 = vsel %vm611_vm14, %v613_v11, %v609_v63  ;;  %v1005_v48 = vmul.f32 0.6931472, %v1535_v15  ;;  %1536 = vrcp.f32 %v578_v8  ;;  %vm622_vm2 = vmor %vm620_vm1, %vm621_vm0  ;;  %v792_v38 = vand.u32 2147483647, %v578_v8 }
 0x20f   :  { %v951_v21 = vmul.f32 %v2134_v13, %v614_v19  ;;  %v617_v56 = vsub.f32 1.0, %v616_v2  ;;  %1538 = vlog2.f32 %v578_v8  ;;  %v794_v11 = vand.u32 2147483648, %v578_v8 }
 0x210   :  { %v1053_v32 = vadd.f32 %v1005_v48, %v2130_v58  ;;  %1325 = vadd.xlane.f32.xlu0 %v1277_v60  ;;  %v627_v58 = vor.u32 1.1754944e-38, %v626_v17  ;;  %vm788_vm5 = vweird.f32 %v578_v8  ;;  %vm2392_vm6 = vcmp.eq.f32.partialorder %v792_v38, 8.507059e+37 }
 0x211   :  { %977 = vst.msk [vmem:[%s2958_s6] sm:$0xff] %vm976_vm15, %v951_v21  ;;  %v618_v44 = vmul.f32 %v1533_v1, %v617_v56  ;;  %v556_v3 = vpop.xlane.xlu0 %555  ;;  %v795_v56 = vor.u32 1.1754944e-38, %v794_v11 }
 0x212   :  { %v1330_v53 = vsub.f32 %v1053_v32, %v2143_v23  ;;  %1540 = vrcp.f32 %v556_v3  ;;  %v640_v0 = vand.u32 2147483648, %v556_v3  ;;  %vm634_vm9 = vweird.f32 %v556_v3 }
 0x213   :  { %v619_v55 = vadd.f32 %v1533_v1, %v618_v44  ;;  %1542 = vlog2.f32 %v556_v3 }
 0x214   :  { %v1537_v13 = vpop.eup %1536  ;;  %1356 = vst.msk [vmem:[%s2957_s7 + $0x8] sm:$0xff] %vm1354_vm10, %v1330_v53 }
 0x215   :  { %v623_v9 = vsel %vm622_vm2, %v1533_v1, %v619_v55  ;;  %v784_v7 = vmul.f32 %v1537_v13, %v578_v8  ;;  %v1539_v12 = vpop.eup %1538  ;;  %vm789_vm4 = vweird.f32 %v1537_v13 }
 0x216   :  { %v628_v42 = vsel %vm625_vm3, %v627_v58, %v623_v9  ;;  %v1029_v52 = vmul.f32 0.6931472, %v1539_v12  ;;  %vm790_vm7 = vmor %vm788_vm5, %vm789_vm4 }
 0x217   :  { %v952_v23 = vmul.f32 %v2145_v25, %v628_v42  ;;  %v785_v5 = vsub.f32 1.0, %v784_v7  ;;  %v641_v7 = vor.u32 1.1754944e-38, %v640_v0 }
 0x218   :  { %v1541_v15 = vpop.eup %1540  ;;  %v1065_v1 = vadd.f32 %v1029_v52, %v2136_v18  ;;  %v638_v18 = vand.u32 2147483647, %v556_v3 }
 0x219   :  { %v1543_v63 = vpop.eup %1542  ;;  %978 = vst.msk [vmem:[%s2958_s6 + $0x8] sm:$0xff] %vm976_vm15, %v952_v23  ;;  %v786_v2 = vmul.f32 %v1537_v13, %v785_v5  ;;  %v630_v60 = vmul.f32 %v1541_v15, %v556_v3  ;;  %v2390_v19 = vpop.xlane.xlu1 %557  ;;  %vm635_vm8 = vweird.f32 %v1541_v15 }
 0x21a   :  { %v1007_v48 = vmul.f32 0.6931472, %v1543_v63  ;;  %1544 = vrcp.f32 %v2390_v19  ;;  %v1342_v17 = vsub.f32 %v1065_v1, %v2141_v22  ;;  %vm636_vm11 = vmor %vm634_vm9, %vm635_vm8  ;;  %vm639_vm12 = vcmp.eq.f32.partialorder %v638_v18, 8.507059e+37 }
 0x21b   :  { %v787_v21 = vadd.f32 %v1537_v13, %v786_v2  ;;  %v631_v32 = vsub.f32 1.0, %v630_v60  ;;  %v2398_v44 = vpop.xlane.xlu0 %579  ;;  %1546 = vlog2.f32 %v2390_v19  ;;  %v652_v38 = vand.u32 2147483647, %v2390_v19 }
 0x21c   :  { %v1054_v53 = vadd.f32 %v1007_v48, %v2147_v29  ;;  %1368 = vst.msk [vmem:[%s2957_s7 + $0x68] sm:$0xff] %vm1354_vm10, %v1342_v17  ;;  %1548 = vrcp.f32 %v2398_v44  ;;  %v806_v1 = vand.u32 2147483647, %v2398_v44  ;;  %vm648_vm14 = vweird.f32 %v2390_v19 }
 0x21d   :  { %v791_v8 = vsel %vm790_vm7, %v1537_v13, %v787_v21  ;;  %v632_v55 = vmul.f32 %v1541_v15, %v631_v32  ;;  %1550 = vlog2.f32 %v2398_v44  ;;  %vm2439_vm0 = vcmp.eq.f32.partialorder %v652_v38, 8.507059e+37 }
 0x21e   :  { %v796_v22 = vsel %vm2392_vm6, %v795_v56, %v791_v8  ;;  %v1331_v58 = vsub.f32 %v1054_v53, %v2152_v31  ;;  %v808_v18 = vand.u32 2147483648, %v2398_v44  ;;  %vm802_vm3 = vweird.f32 %v2398_v44 }
 0x21f   :  { %v964_v9 = vmul.f32 %v2156_v30, %v796_v22  ;;  %v633_v29 = vadd.f32 %v1541_v15, %v632_v55  ;;  %vm2452_vm4 = vcmp.eq.f32.partialorder %v806_v1, 8.507059e+37 }
 0x220   :  { %v1545_v13 = vpop.eup %1544  ;;  %1357 = vst.msk [vmem:[%s2957_s7 + $0x10] sm:$0xff] %vm1354_vm10, %v1331_v58 }
 0x221   :  { %990 = vst.msk [vmem:[%s2958_s6 + $0x68] sm:$0xff] %vm976_vm15, %v964_v9  ;;  %v637_v31 = vsel %vm636_vm11, %v1541_v15, %v633_v29  ;;  %v644_v30 = vmul.f32 %v1545_v13, %v2390_v19  ;;  %v2421_v3 = vpop.xlane.xlu1 %581  ;;  %v1547_v12 = vpop.eup %1546  ;;  %v654_v15 = vand.u32 2147483648, %v2390_v19  ;;  %vm649_vm13 = vweird.f32 %v1545_v13 }
 0x222   :  { %v642_v42 = vsel %vm639_vm12, %v641_v7, %v637_v31  ;;  %1552 = vrcp.f32 %v2421_v3  ;;  %v1549_v23 = vpop.eup %1548  ;;  %v1009_v52 = vmul.f32 0.6931472, %v1547_v12  ;;  %vm650_vm1 = vmor %vm648_vm14, %vm649_vm13  ;;  %v822_v29 = vand.u32 2147483648, %v2421_v3 }
 0x223   :  { %v953_v5 = vmul.f32 %v2165_v28, %v642_v42  ;;  %v645_v11 = vsub.f32 1.0, %v644_v30  ;;  %v2426_v63 = vpop.xlane.xlu2 %559  ;;  %v798_v2 = vmul.f32 %v1549_v23, %v2398_v44  ;;  %1554 = vlog2.f32 %v2421_v3  ;;  %v1551_v60 = vpop.eup %1550 }
 0x224   :  { %v1055_v28 = vadd.f32 %v1009_v52, %v2158_v35  ;;  %1556 = vrcp.f32 %v2426_v63  ;;  %v1031_v56 = vmul.f32 0.6931472, %v1551_v60  ;;  %v655_v35 = vor.u32 1.1754944e-38, %v654_v15 }
 0x225   :  { %979 = vst.msk [vmem:[%s2958_s6 + $0x10] sm:$0xff] %vm976_vm15, %v953_v5  ;;  %v646_v25 = vmul.f32 %v1545_v13, %v645_v11  ;;  %v799_v21 = vsub.f32 1.0, %v798_v2  ;;  %1558 = vlog2.f32 %v2426_v63  ;;  %vm803_vm2 = vweird.f32 %v1549_v23 }
 0x226   :  { %v1332_v32 = vsub.f32 %v1055_v28, %v2174_v59  ;;  %v1066_v19 = vadd.f32 %v1031_v56, %v2163_v41  ;;  %vm804_vm5 = vmor %vm802_vm3, %vm803_vm2  ;;  %v809_v44 = vor.u32 1.1754944e-38, %v808_v18  ;;  %vm816_vm6 = vweird.f32 %v2421_v3 }
 0x227   :  { %v647_v17 = vadd.f32 %v1545_v13, %v646_v25  ;;  %v800_v53 = vmul.f32 %v1549_v23, %v799_v21  ;;  %v820_v42 = vand.u32 2147483647, %v2421_v3  ;;  %v823_v52 = vor.u32 1.1754944e-38, %v822_v29 }
 0x228   :  { %v1553_v0 = vpop.eup %1552  ;;  %1358 = vst.msk [vmem:[%s2957_s7 + $0x18] sm:$0xff] %vm1354_vm10, %v1332_v32  ;;  %v1343_v41 = vsub.f32 %v1066_v19, %v2154_v34  ;;  %v666_v25 = vand.u32 2147483647, %v2426_v63  ;;  %v668_v28 = vand.u32 2147483648, %v2426_v63  ;;  %vm662_vm12 = vweird.f32 %v2426_v63 }
 0x229   :  { %v651_v8 = vsel %vm650_vm1, %v1545_v13, %v647_v17  ;;  %v812_v55 = vmul.f32 %v1553_v0, %v2421_v3  ;;  %v1555_v22 = vpop.eup %1554  ;;  %v801_v9 = vadd.f32 %v1549_v23, %v800_v53  ;;  %vm817_vm7 = vweird.f32 %v1553_v0 }
 0x22a   :  { %v656_v58 = vsel %vm2439_vm0, %v655_v35, %v651_v8  ;;  %v1557_v13 = vpop.eup %1556  ;;  %v1033_v30 = vmul.f32 0.6931472, %v1555_v22  ;;  %1369 = vst.msk [vmem:[%s2957_s7 + $0x70] sm:$0xff] %vm1354_vm10, %v1343_v41  ;;  %vm818_vm8 = vmor %vm816_vm6, %vm817_vm7  ;;  %vm821_vm11 = vcmp.eq.f32.partialorder %v820_v42, 8.507059e+37  ;;  %v669_v32 = vor.u32 1.1754944e-38, %v668_v28 }
 0x22b   :  { %v954_v7 = vmul.f32 %v2178_v62, %v656_v58  ;;  %v813_v31 = vsub.f32 1.0, %v812_v55  ;;  %v805_v12 = vsel %vm804_vm5, %v1549_v23, %v801_v9  ;;  %v658_v34 = vmul.f32 %v1557_v13, %v2426_v63  ;;  %v1559_v38 = vpop.eup %1558 }
 0x22c   :  { %v810_v62 = vsel %vm2452_vm4, %v809_v44, %v805_v12  ;;  %v1067_v5 = vadd.f32 %v1033_v30, %v2169_v46  ;;  %v1011_v2 = vmul.f32 0.6931472, %v1559_v38  ;;  %vm663_vm9 = vweird.f32 %v1557_v13 }
 0x22d   :  { %980 = vst.msk [vmem:[%s2958_s6 + $0x18] sm:$0xff] %vm976_vm15, %v954_v7  ;;  %v814_v23 = vmul.f32 %v1553_v0, %v813_v31  ;;  %v965_v11 = vmul.f32 %v2183_v4, %v810_v62  ;;  %v659_v15 = vsub.f32 1.0, %v658_v34  ;;  %vm664_vm13 = vmor %vm662_vm12, %vm663_vm9  ;;  %vm667_vm14 = vcmp.eq.f32.partialorder %v666_v25, 8.507059e+37 }
 0x22e   :  { %v1344_v60 = vsub.f32 %v1067_v5, %v2188_v50  ;;  %v1056_v4 = vadd.f32 %v1011_v2, %v2176_v61  ;;  %v3024_v5 = vld [vmem:[#allocation9_spill] sm:$0xff] }
 0x22f   :  { %v815_v1 = vadd.f32 %v1553_v0, %v814_v23  ;;  %v2480_v48 = vpop.xlane.xlu1 %563  ;;  %991 = vst.msk [vmem:[%s2958_s6 + $0x70] sm:$0xff] %vm976_vm15, %v965_v11  ;;  %v660_v46 = vmul.f32 %v1557_v13, %v659_v15 }
 0x230   :  { %1560 = vrcp.f32 %v2480_v48  ;;  %1370 = vst.msk [vmem:[%s2957_s7 + $0x78] sm:$0xff] %vm1354_vm10, %v1344_v60  ;;  %v1333_v17 = vsub.f32 %v1056_v4, %v2190_v16  ;;  %v694_v18 = vand.u32 2147483647, %v2480_v48  ;;  %v696_v63 = vand.u32 2147483648, %v2480_v48 }
 0x231   :  { %v819_v50 = vsel %vm818_vm8, %v1553_v0, %v815_v1  ;;  %1562 = vlog2.f32 %v2480_v48  ;;  %v2496_v21 = vpop.xlane.xlu2 %583  ;;  %v661_v56 = vadd.f32 %v1557_v13, %v660_v46  ;;  %vm690_vm0 = vweird.f32 %v2480_v48 }
 0x232   :  { %v824_v3 = vsel %vm821_vm11, %v823_v52, %v819_v50  ;;  %1564 = vrcp.f32 %v2496_v21  ;;  %1359 = vst.msk [vmem:[%s2957_s7 + $0x20] sm:$0xff] %vm1354_vm10, %v1333_v17  ;;  %vm2518_vm1 = vcmp.eq.f32.partialorder %v694_v18, 8.507059e+37  ;;  %v834_v9 = vand.u32 2147483647, %v2496_v21 }
 0x233   :  { %v966_v61 = vmul.f32 %v2192_v20, %v824_v3  ;;  %v2502_v0 = vpop.xlane.xlu0 %561  ;;  %v665_v35 = vsel %vm664_vm13, %v1557_v13, %v661_v56  ;;  %vm830_vm2 = vweird.f32 %v2496_v21  ;;  %v836_v13 = vand.u32 2147483648, %v2496_v21 }
 0x234   :  { %1566 = vrcp.f32 %v2502_v0  ;;  %v670_v16 = vsel %vm667_vm14, %v669_v32, %v665_v35  ;;  %vm676_vm3 = vweird.f32 %v2502_v0  ;;  %v680_v31 = vand.u32 2147483647, %v2502_v0 }
 0x235   :  { %992 = vst.msk [vmem:[%s2958_s6 + $0x78] sm:$0xff] %vm976_vm15, %v966_v61  ;;  %v955_v53 = vmul.f32 %v2195_v54, %v670_v16  ;;  %1568 = vlog2.f32 %v2502_v0  ;;  %v697_v54 = vor.u32 1.1754944e-38, %v696_v63  ;;  %v682_v30 = vand.u32 2147483648, %v2502_v0 }
 0x236   :  { %v1561_v20 = vpop.eup %1560  ;;  %vm2541_vm6 = vcmp.eq.f32.partialorder %v834_v9, 8.507059e+37  ;;  %vm2552_vm9 = vcmp.eq.f32.partialorder %v680_v31, 8.507059e+37 }
 0x237   :  { %v1563_v19 = vpop.eup %1562  ;;  %v686_v8 = vmul.f32 %v1561_v20, %v2480_v48  ;;  %v2522_v55 = vpop.xlane.xlu1 %587  ;;  %981 = vst.msk [vmem:[%s2958_s6 + $0x20] sm:$0xff] %vm976_vm15, %v955_v53  ;;  %vm691_vm4 = vweird.f32 %v1561_v20  ;;  %v683_v60 = vor.u32 1.1754944e-38, %v682_v30 }
 0x238   :  { %v1565_v22 = vpop.eup %1564  ;;  %v1015_v58 = vmul.f32 0.6931472, %v1563_v19  ;;  %1570 = vrcp.f32 %v2522_v55  ;;  %vm692_vm7 = vmor %vm690_vm0, %vm691_vm4  ;;  %v862_v3 = vand.u32 2147483647, %v2522_v55  ;;  %v864_v16 = vand.u32 2147483648, %v2522_v55 }
 0x239   :  { %v687_v41 = vsub.f32 1.0, %v686_v8  ;;  %v826_v29 = vmul.f32 %v1565_v22, %v2496_v21  ;;  %vm831_vm5 = vweird.f32 %v1565_v22  ;;  %v3021_v8 = vld [vmem:[#allocation6_spill] sm:$0xff]  ;;  %vm858_vm14 = vweird.f32 %v2522_v55 }
 0x23a   :  { %v1567_v7 = vpop.eup %1566  ;;  %v1058_v44 = vadd.f32 %v1015_v58, %v2197_v24  ;;  %vm832_vm11 = vmor %vm830_vm2, %vm831_vm5  ;;  %vm863_vm0 = vcmp.eq.f32.partialorder %v862_v3, 8.507059e+37 }
 0x23b   :  { %v688_v12 = vmul.f32 %v1561_v20, %v687_v41  ;;  %v827_v42 = vsub.f32 1.0, %v826_v29  ;;  %v672_v34 = vmul.f32 %v1567_v7, %v2502_v0  ;;  %v2538_v38 = vpop.xlane.xlu0 %585  ;;  %v1569_v62 = vpop.eup %1568  ;;  %vm677_vm8 = vweird.f32 %v1567_v7 }
 0x23c   :  { %v1335_v23 = vsub.f32 %v1058_v44, %v2214_v6  ;;  %1572 = vrcp.f32 %v2538_v38  ;;  %v1013_v15 = vmul.f32 0.6931472, %v1569_v62  ;;  %v837_v6 = vor.u32 1.1754944e-38, %v836_v13  ;;  %vm678_vm12 = vmor %vm676_vm3, %vm677_vm8 }
 0x23d   :  { %v689_v24 = vadd.f32 %v1561_v20, %v688_v12  ;;  %v828_v11 = vmul.f32 %v1565_v22, %v827_v42  ;;  %v673_v52 = vsub.f32 1.0, %v672_v34  ;;  %1574 = vlog2.f32 %v2496_v21 }
 0x23e   :  { %v1571_v2 = vpop.eup %1570  ;;  %1361 = vst.msk [vmem:[%s2957_s7 + $0x30] sm:$0xff] %vm1354_vm10, %v1335_v23  ;;  %v1057_v4 = vadd.f32 %v1013_v15, %v2206_v45  ;;  %v848_v53 = vand.u32 2147483647, %v2538_v38  ;;  %v865_v41 = vor.u32 1.1754944e-38, %v864_v16  ;;  %vm844_vm2 = vweird.f32 %v2538_v38 }
 0x23f   :  { %v693_v25 = vsel %vm692_vm7, %v1561_v20, %v689_v24  ;;  %v829_v28 = vadd.f32 %v1565_v22, %v828_v11  ;;  %v674_v46 = vmul.f32 %v1567_v7, %v673_v52  ;;  %v854_v50 = vmul.f32 %v1571_v2, %v2522_v55 }
 0x240   :  { %v698_v48 = vsel %vm2518_vm1, %v697_v54, %v693_v25  ;;  %v1334_v32 = vsub.f32 %v1057_v4, %v2185_v10  ;;  %v3020_v10 = vld [vmem:[#allocation5_spill] sm:$0xff]  ;;  %vm859_vm13 = vweird.f32 %v1571_v2  ;;  %v850_v54 = vand.u32 2147483648, %v2538_v38  ;;  %v3027_v4 = vld [vmem:[#allocation11_spill] sm:$0xff] }
 0x241   :  { %v957_v56 = vmul.f32 %v2216_v26, %v698_v48  ;;  %v833_v17 = vsel %vm832_vm11, %v1565_v22, %v829_v28  ;;  %v675_v61 = vadd.f32 %v1567_v7, %v674_v46  ;;  %v2567_v45 = vpop.xlane.xlu2 %565  ;;  %v855_v63 = vsub.f32 1.0, %v854_v50  ;;  %vm860_vm1 = vmor %vm858_vm14, %vm859_vm13 }
 0x242   :  { %v1573_v18 = vpop.eup %1572  ;;  %v838_v35 = vsel %vm2541_vm6, %v837_v6, %v833_v17  ;;  %1576 = vrcp.f32 %v2567_v45  ;;  %1360 = vst.msk [vmem:[%s2957_s7 + $0x28] sm:$0xff] %vm1354_vm10, %v1334_v32  ;;  %vm2605_vm4 = vcmp.eq.f32.partialorder %v848_v53, 8.507059e+37  ;;  %v851_v42 = vor.u32 1.1754944e-38, %v850_v54  ;;  %v3028_v17 = vld [vmem:[#allocation8_spill] sm:$0xff] }
 0x243   :  { %983 = vst.msk [vmem:[%s2958_s6 + $0x30] sm:$0xff] %vm976_vm15, %v957_v56  ;;  %v967_v26 = vmul.f32 %v3020_v10, %v838_v35  ;;  %v679_v21 = vsel %vm678_vm12, %v1567_v7, %v675_v61  ;;  %v840_v20 = vmul.f32 %v1573_v18, %v2538_v38  ;;  %v856_v19 = vmul.f32 %v1571_v2, %v855_v63  ;;  %v1575_v58 = vpop.eup %1574 }
 0x244   :  { %v684_v0 = vsel %vm2552_vm9, %v683_v60, %v679_v21  ;;  %1578 = vlog2.f32 %v2522_v55  ;;  %vm845_vm3 = vweird.f32 %v1573_v18  ;;  %v708_v55 = vand.u32 2147483647, %v2567_v45  ;;  %v3031_v21 = vld [vmem:[#allocation10_spill] sm:$0xff] }
 0x245   :  { %993 = vst.msk [vmem:[%s2958_s6 + $0x80] sm:$0xff] %vm976_vm15, %v967_v26  ;;  %v956_v59 = vmul.f32 %v3021_v8, %v684_v0  ;;  %v841_v22 = vsub.f32 1.0, %v840_v20  ;;  %1580 = vlog2.f32 %v2567_v45  ;;  %v857_v9 = vadd.f32 %v1571_v2, %v856_v19  ;;  %vm846_vm5 = vmor %vm844_vm2, %vm845_vm3 }
 0x246   :  { %vm704_vm6 = vweird.f32 %v2567_v45  ;;  %v710_v11 = vand.u32 2147483648, %v2567_v45  ;;  %vm2630_vm7 = vcmp.eq.f32.partialorder %v708_v55, 8.507059e+37  ;;  %v2638_v32 = vmul.f32 0.6931472, %v1575_v58 }
 0x247   :  { %982 = vst.msk [vmem:[%s2958_s6 + $0x28] sm:$0xff] %vm976_vm15, %v956_v59  ;;  %v842_v29 = vmul.f32 %v1573_v18, %v841_v22  ;;  %v2603_v13 = vpop.xlane.xlu1 %569  ;;  %v861_v44 = vsel %vm860_vm1, %v1571_v2, %v857_v9 }
 0x248   :  { %v1577_v7 = vpop.eup %1576  ;;  %1582 = vrcp.f32 %v2603_v13  ;;  %v866_v30 = vsel %vm863_vm0, %v865_v41, %v861_v44  ;;  %v736_v6 = vand.u32 2147483647, %v2603_v13  ;;  %v738_v46 = vand.u32 2147483648, %v2603_v13  ;;  %v3032_v44 = vld [vmem:[#allocation12_spill] sm:$0xff] }
 0x249   :  { %v843_v12 = vadd.f32 %v1573_v18, %v842_v29  ;;  %v700_v34 = vmul.f32 %v1577_v7, %v2567_v45  ;;  %v2612_v62 = vpop.xlane.xlu2 %589  ;;  %v969_v24 = vmul.f32 %v3024_v5, %v866_v30  ;;  %1584 = vlog2.f32 %v2603_v13 }
 0x24a   :  { %v1579_v23 = vpop.eup %1578  ;;  %1586 = vrcp.f32 %v2612_v62  ;;  %vm705_vm8 = vweird.f32 %v1577_v7  ;;  %v711_v56 = vor.u32 1.1754944e-38, %v710_v11  ;;  %vm732_vm9 = vweird.f32 %v2603_v13 }
 0x24b   :  { %v1581_v52 = vpop.eup %1580  ;;  %v847_v15 = vsel %vm846_vm5, %v1573_v18, %v843_v12  ;;  %v701_v2 = vsub.f32 1.0, %v700_v34  ;;  %v2622_v1 = vpop.xlane.xlu0 %567  ;;  %995 = vst.msk [vmem:[%s2958_s6 + $0x90] sm:$0xff] %vm976_vm15, %v969_v24  ;;  %v2640_v18 = vmul.f32 0.6931472, %v1579_v23  ;;  %vm2648_vm11 = vcmp.eq.f32.partialorder %v736_v6, 8.507059e+37  ;;  %vm706_vm12 = vmor %vm704_vm6, %vm705_vm8 }
 0x24c   :  { %v852_v60 = vsel %vm2605_vm4, %v851_v42, %v847_v15  ;;  %v1017_v28 = vmul.f32 0.6931472, %v1581_v52  ;;  %1588 = vrcp.f32 %v2622_v1  ;;  %v739_v53 = vor.u32 1.1754944e-38, %v738_v46 }
 0x24d   :  { %v968_v48 = vmul.f32 %v3027_v4, %v852_v60  ;;  %v702_v50 = vmul.f32 %v1577_v7, %v701_v2  ;;  %vm872_vm13 = vweird.f32 %v2612_v62  ;;  %v876_v0 = vand.u32 2147483647, %v2612_v62 }
 0x24e   :  { %v1583_v3 = vpop.eup %1582  ;;  %v1059_v61 = vadd.f32 %v1017_v28, %v3028_v17  ;;  %1590 = vlog2.f32 %v2622_v1  ;;  %v878_v58 = vand.u32 2147483648, %v2612_v62  ;;  %v722_v9 = vand.u32 2147483647, %v2622_v1 }
 0x24f   :  { %994 = vst.msk [vmem:[%s2958_s6 + $0x88] sm:$0xff] %vm976_vm15, %v968_v48  ;;  %v703_v35 = vadd.f32 %v1577_v7, %v702_v50  ;;  %v728_v63 = vmul.f32 %v1583_v3, %v2603_v13  ;;  %v2652_v10 = vpop.xlane.xlu1 %593  ;;  %v1585_v26 = vpop.eup %1584  ;;  %vm733_vm14 = vweird.f32 %v1583_v3  ;;  %vm2674_vm0 = vcmp.eq.f32.partialorder %v876_v0, 8.507059e+37  ;;  %v3037_v48 = vld [vmem:[#allocation14_spill] sm:$0xff] }
 0x250   :  { %v1336_v20 = vsub.f32 %v1059_v61, %v3031_v21  ;;  %v1587_v19 = vpop.eup %1586  ;;  %v1021_v22 = vmul.f32 0.6931472, %v1585_v26  ;;  %1592 = vrcp.f32 %v2652_v10  ;;  %vm718_vm1 = vweird.f32 %v2622_v1  ;;  %vm734_vm2 = vmor %vm732_vm9, %vm733_vm14  ;;  %v3038_v26 = vld [vmem:[#allocation7_spill] sm:$0xff] }
 0x251   :  { %v707_v8 = vsel %vm706_vm12, %v1577_v7, %v703_v35  ;;  %v729_v59 = vsub.f32 1.0, %v728_v63  ;;  %v868_v45 = vmul.f32 %v1587_v19, %v2612_v62  ;;  %v724_v23 = vand.u32 2147483648, %v2622_v1 }
 0x252   :  { %v712_v54 = vsel %vm2630_vm7, %v711_v56, %v707_v8  ;;  %1362 = vst.msk [vmem:[%s2957_s7 + $0x38] sm:$0xff] %vm1354_vm10, %v1336_v20  ;;  %v1589_v41 = vpop.eup %1588  ;;  %v1061_v31 = vadd.f32 %v1021_v22, %v3032_v44  ;;  %vm873_vm3 = vweird.f32 %v1587_v19  ;;  %v879_v11 = vor.u32 1.1754944e-38, %v878_v58  ;;  %v3039_v20 = vld [vmem:[#allocation17_spill] sm:$0xff] }
 0x253   :  { %v958_v29 = vmul.f32 %v2253_v36, %v712_v54  ;;  %v730_v7 = vmul.f32 %v1583_v3, %v729_v59  ;;  %v2672_v55 = vpop.xlane.xlu0 %591  ;;  %v869_v30 = vsub.f32 1.0, %v868_v45  ;;  %v714_v42 = vmul.f32 %v1589_v41, %v2622_v1  ;;  %vm874_vm6 = vmor %vm872_vm13, %vm873_vm3  ;;  %v3042_v54 = vld [vmem:[#allocation18_spill] sm:$0xff] }
 0x254   :  { %v1338_v34 = vsub.f32 %v1061_v31, %v2262_v47  ;;  %1594 = vrcp.f32 %v2672_v55  ;;  %v1591_v5 = vpop.eup %1590  ;;  %vm719_vm4 = vweird.f32 %v1589_v41  ;;  %vm2693_vm5 = vcmp.eq.f32.partialorder %v722_v9, 8.507059e+37 }
 0x255   :  { %984 = vst.msk [vmem:[%s2958_s6 + $0x38] sm:$0xff] %vm976_vm15, %v958_v29  ;;  %v731_v36 = vadd.f32 %v1583_v3, %v730_v7  ;;  %v870_v24 = vmul.f32 %v1587_v19, %v869_v30  ;;  %v715_v52 = vsub.f32 1.0, %v714_v42  ;;  %v1019_v6 = vmul.f32 0.6931472, %v1591_v5  ;;  %vm720_vm7 = vmor %vm718_vm1, %vm719_vm4 }
 0x256   :  { %v1593_v15 = vpop.eup %1592  ;;  %1364 = vst.msk [vmem:[%s2957_s7 + $0x48] sm:$0xff] %vm1354_vm10, %v1338_v34  ;;  %v725_v4 = vor.u32 1.1754944e-38, %v724_v23  ;;  %v906_v63 = vand.u32 2147483648, %v2652_v10  ;;  %vm900_vm9 = vweird.f32 %v2652_v10  ;;  %v890_v22 = vand.u32 2147483647, %v2672_v55 }
 0x257   :  { %v735_v2 = vsel %vm734_vm2, %v1583_v3, %v731_v36  ;;  %v871_v60 = vadd.f32 %v1587_v19, %v870_v24  ;;  %v716_v25 = vmul.f32 %v1589_v41, %v715_v52  ;;  %v896_v28 = vmul.f32 %v1593_v15, %v2652_v10 }
 0x258   :  { %v740_v13 = vsel %vm2648_vm11, %v739_v53, %v735_v2  ;;  %v1060_v50 = vadd.f32 %v1019_v6, %v3037_v48  ;;  %v904_v3 = vand.u32 2147483647, %v2652_v10  ;;  %vm901_vm8 = vweird.f32 %v1593_v15  ;;  %v3047_v6 = vld [vmem:[#allocation2_spill] sm:$0xff] }
 0x259   :  { %v960_v46 = vmul.f32 %v2264_v57, %v740_v13  ;;  %v2705_v56 = vpop.xlane.xlu2 %571  ;;  %v875_v17 = vsel %vm874_vm6, %v1587_v19, %v871_v60  ;;  %v717_v61 = vadd.f32 %v1589_v41, %v716_v25  ;;  %v897_v35 = vsub.f32 1.0, %v896_v28  ;;  %vm902_vm12 = vmor %vm900_vm9, %vm901_vm8  ;;  %v3048_v25 = vld [vmem:[#allocation3_spill] sm:$0xff] }
 0x25a   :  { %v1595_v16 = vpop.eup %1594  ;;  %v880_v57 = vsel %vm2674_vm0, %v879_v11, %v875_v17  ;;  %v1337_v21 = vsub.f32 %v1060_v50, %v3038_v26  ;;  %1596 = vrcp.f32 %v2705_v56  ;;  %vm2728_vm11 = vcmp.eq.f32.partialorder %v904_v3, 8.507059e+37  ;;  %v3049_v3 = vld [vmem:[#allocation22_spill] sm:$0xff] }
 0x25b   :  { %986 = vst.msk [vmem:[%s2958_s6 + $0x48] sm:$0xff] %vm976_vm15, %v960_v46  ;;  %v970_v53 = vmul.f32 %v3039_v20, %v880_v57  ;;  %v721_v0 = vsel %vm720_vm7, %v1589_v41, %v717_v61  ;;  %v898_v19 = vmul.f32 %v1593_v15, %v897_v35  ;;  %v882_v8 = vmul.f32 %v1595_v16, %v2672_v55 }
 0x25c   :  { %v726_v59 = vsel %vm2693_vm5, %v725_v4, %v721_v0  ;;  %1363 = vst.msk [vmem:[%s2957_s7 + $0x40] sm:$0xff] %vm1354_vm10, %v1337_v21  ;;  %v892_v41 = vand.u32 2147483648, %v2672_v55  ;;  %v907_v29 = vor.u32 1.1754944e-38, %v906_v63  ;;  %vm886_vm13 = vweird.f32 %v2672_v55  ;;  %v3052_v21 = vld [vmem:[#allocation20_spill] sm:$0xff] }
 0x25d   :  { %996 = vst.msk [vmem:[%s2958_s6 + $0x98] sm:$0xff] %vm976_vm15, %v970_v53  ;;  %v959_v45 = vmul.f32 %v3042_v54, %v726_v59  ;;  %v899_v58 = vadd.f32 %v1593_v15, %v898_v19  ;;  %v883_v9 = vsub.f32 1.0, %v882_v8  ;;  %v750_v7 = vand.u32 2147483647, %v2705_v56 }
 0x25e   :  { %1598 = vlog2.f32 %v2705_v56  ;;  %vm887_vm14 = vweird.f32 %v1595_v16  ;;  %vm2752_vm0 = vcmp.eq.f32.partialorder %v890_v22, 8.507059e+37  ;;  %vm746_vm1 = vweird.f32 %v2705_v56  ;;  %v3053_v22 = vld [vmem:[#allocation21_spill] sm:$0xff] }
 0x25f   :  { %v2743_v44 = vpop.xlane.xlu1 %575  ;;  %985 = vst.msk [vmem:[%s2958_s6 + $0x40] sm:$0xff] %vm976_vm15, %v959_v45  ;;  %v903_v31 = vsel %vm902_vm12, %v1593_v15, %v899_v58  ;;  %v884_v30 = vmul.f32 %v1595_v16, %v883_v9  ;;  %v752_v34 = vand.u32 2147483648, %v2705_v56  ;;  %v893_v11 = vor.u32 1.1754944e-38, %v892_v41  ;;  %vm888_vm2 = vmor %vm886_vm13, %vm887_vm14 }
 0x260   :  { %1600 = vrcp.f32 %v2743_v44  ;;  %v1597_v12 = vpop.eup %1596  ;;  %v908_v42 = vsel %vm2728_vm11, %v907_v29, %v903_v31  ;;  %vm2764_vm3 = vcmp.eq.f32.partialorder %v750_v7, 8.507059e+37  ;;  %v778_v2 = vand.u32 2147483647, %v2743_v44 }
 0x261   :  { %v2758_v23 = vpop.xlane.xlu2 %595  ;;  %v972_v5 = vmul.f32 %v2281_v27, %v908_v42  ;;  %v885_v24 = vadd.f32 %v1595_v16, %v884_v30  ;;  %v742_v52 = vmul.f32 %v1597_v12, %v2705_v56  ;;  %1602 = vlog2.f32 %v2743_v44 }
 0x262   :  { %v2774_v27 = vadd.f32 %v2638_v32, %v3047_v6  ;;  %1604 = vrcp.f32 %v2758_v23  ;;  %v2783_v28 = vadd.f32 %v2640_v18, %v3048_v25  ;;  %v753_v48 = vor.u32 1.1754944e-38, %v752_v34 }
 0x263   :  { %v2770_v47 = vpop.xlane.xlu0 %573  ;;  %998 = vst.msk [vmem:[%s2958_s6 + $0xa8] sm:$0xff] %vm976_vm15, %v972_v5  ;;  %v889_v13 = vsel %vm888_vm2, %v1595_v16, %v885_v24  ;;  %v743_v60 = vsub.f32 1.0, %v742_v52  ;;  %v780_v32 = vand.u32 2147483648, %v2743_v44  ;;  %vm747_vm4 = vweird.f32 %v1597_v12 }
 0x264   :  { %v1599_v46 = vpop.eup %1598  ;;  %v894_v4 = vsel %vm2752_vm0, %v893_v11, %v889_v13  ;;  %1606 = vrcp.f32 %v2770_v47  ;;  %vm774_vm5 = vweird.f32 %v2743_v44  ;;  %vm2792_vm6 = vcmp.eq.f32.partialorder %v778_v2, 8.507059e+37  ;;  %vm748_vm7 = vmor %vm746_vm1, %vm747_vm4 }
 0x265   :  { %v971_v17 = vmul.f32 %v3049_v3, %v894_v4  ;;  %v744_v61 = vmul.f32 %v1597_v12, %v743_v60  ;;  %v1023_v35 = vmul.f32 0.6931472, %v1599_v46  ;;  %v918_v16 = vand.u32 2147483647, %v2758_v23 }
 0x266   :  { %v1601_v50 = vpop.eup %1600  ;;  %v920_v53 = vand.u32 2147483648, %v2758_v23  ;;  %1608 = vlog2.f32 %v2770_v47  ;;  %v781_v8 = vor.u32 1.1754944e-38, %v780_v32  ;;  %vm914_vm8 = vweird.f32 %v2758_v23 }
 0x267   :  { %v770_v63 = vmul.f32 %v1601_v50, %v2743_v44  ;;  %v2797_v57 = vpop.xlane.xlu1 %599  ;;  %997 = vst.msk [vmem:[%s2958_s6 + $0xa0] sm:$0xff] %vm976_vm15, %v971_v17  ;;  %v745_v26 = vadd.f32 %v1597_v12, %v744_v61  ;;  %v1062_v20 = vadd.f32 %v1023_v35, %v3052_v21  ;;  %v1603_v0 = vpop.eup %1602  ;;  %vm760_vm9 = vweird.f32 %v2770_v47 }
 0x268   :  { %1610 = vrcp.f32 %v2797_v57  ;;  %v1605_v59 = vpop.eup %1604  ;;  %v1027_v45 = vmul.f32 0.6931472, %v1603_v0  ;;  %vm775_vm11 = vweird.f32 %v1601_v50  ;;  %vm2815_vm12 = vcmp.eq.f32.partialorder %v918_v16, 8.507059e+37 }
 0x269   :  { %v771_v19 = vsub.f32 1.0, %v770_v63  ;;  %v749_v1 = vsel %vm748_vm7, %v1597_v12, %v745_v26  ;;  %v1339_v54 = vsub.f32 %v1062_v20, %v3053_v22  ;;  %v910_v56 = vmul.f32 %v1605_v59, %v2758_v23  ;;  %v1312_v7 = vpop.xlane.xlu2 %1311  ;;  %v3056_v12 = vld [vmem:[#allocation23_spill] sm:$0xff]  ;;  %vm776_vm13 = vmor %vm774_vm5, %vm775_vm11 }
 0x26a   :  { %v1607_v58 = vpop.eup %1606  ;;  %v754_v9 = vsel %vm2764_vm3, %v753_v48, %v749_v1  ;;  %v1064_v42 = vadd.f32 %v1027_v45, %v3056_v12  ;;  %v921_v36 = vor.u32 1.1754944e-38, %v920_v53  ;;  %v764_v11 = vand.u32 2147483647, %v2770_v47 }
 0x26b   :  { %v772_v41 = vmul.f32 %v1601_v50, %v771_v19  ;;  %v2819_v31 = vpop.xlane.xlu0 %597  ;;  %v961_v30 = vmul.f32 %v2301_v49, %v754_v9  ;;  %1365 = vst.msk [vmem:[%s2957_s7 + $0x50] sm:$0xff] %vm1354_vm10, %v1339_v54  ;;  %v756_v34 = vmul.f32 %v1607_v58, %v2770_v47  ;;  %v911_v24 = vsub.f32 1.0, %v910_v56 }
 0x26c   :  { %v766_v52 = vand.u32 2147483648, %v2770_v47  ;;  %v1609_v15 = vpop.eup %1608  ;;  %v1341_v49 = vsub.f32 %v1064_v42, %v2330_v37  ;;  %v1345_v6 = vsub.f32 %v2774_v27, %v1312_v7  ;;  %1612 = vrcp.f32 %v2819_v31 }
 0x26d   :  { %v773_v5 = vadd.f32 %v1601_v50, %v772_v41  ;;  %987 = vst.msk [vmem:[%s2958_s6 + $0x50] sm:$0xff] %vm976_vm15, %v961_v30  ;;  %v757_v2 = vsub.f32 1.0, %v756_v34  ;;  %v912_v25 = vmul.f32 %v1605_v59, %v911_v24  ;;  %vm915_vm14 = vweird.f32 %v1605_v59  ;;  %v3060_v34 = vld [vmem:[#allocation13_spill] sm:$0xff] }
 0x26e   :  { %v1611_v13 = vpop.eup %1610  ;;  %v1025_v46 = vmul.f32 0.6931472, %v1609_v15  ;;  %1367 = vst.msk [vmem:[%s2957_s7 + $0x60] sm:$0xff] %vm1354_vm10, %v1341_v49  ;;  %vm761_vm0 = vweird.f32 %v1607_v58  ;;  %vm2848_vm1 = vcmp.eq.f32.partialorder %v764_v11, 8.507059e+37  ;;  %vm916_vm2 = vmor %vm914_vm8, %vm915_vm14  ;;  %v767_v61 = vor.u32 1.1754944e-38, %v766_v52  ;;  %v3061_v52 = vld [vmem:[#allocation4_spill] sm:$0xff] }
 0x26f   :  { %v777_v60 = vsel %vm776_vm13, %v1601_v50, %v773_v5  ;;  %v1316_v4 = vpop.xlane.xlu1 %1315  ;;  %v758_v37 = vmul.f32 %v1607_v58, %v757_v2  ;;  %v938_v44 = vmul.f32 %v1611_v13, %v2797_v57  ;;  %v913_v32 = vadd.f32 %v1605_v59, %v912_v25  ;;  %1371 = vst.msk [vmem:[%s2957_s7 + $0x80] sm:$0xff] %vm1354_vm10, %v1345_v6  ;;  %vm762_vm3 = vmor %vm760_vm9, %vm761_vm0  ;;  %v3062_v6 = vld [vmem:[#allocation15_spill] sm:$0xff] }
 0x270   :  { %v782_v48 = vsel %vm2792_vm6, %v781_v8, %v777_v60  ;;  %v1063_v3 = vadd.f32 %v1025_v46, %v2299_v51  ;;  %v3059_v51 = vld [vmem:[#allocation19_spill] sm:$0xff]  ;;  %v948_v16 = vand.u32 2147483648, %v2797_v57  ;;  %v1347_v26 = vsub.f32 %v2783_v28, %v1316_v4  ;;  %v3063_v4 = vld [vmem:[#allocation24_spill] sm:$0xff] }
 0x271   :  { %v963_v27 = vmul.f32 %v2310_v33, %v782_v48  ;;  %v759_v17 = vadd.f32 %v1607_v58, %v758_v37  ;;  %v939_v35 = vsub.f32 1.0, %v938_v44  ;;  %v946_v33 = vand.u32 2147483647, %v2797_v57 }
 0x272   :  { %v917_v63 = vsel %vm916_vm2, %v1605_v59, %v913_v32  ;;  %v1340_v18 = vsub.f32 %v1063_v3, %v3059_v51  ;;  %v1613_v20 = vpop.eup %1612  ;;  %vm943_vm4 = vweird.f32 %v1611_v13  ;;  %vm942_vm5 = vweird.f32 %v2797_v57  ;;  %1373 = vst.msk [vmem:[%s2957_s7 + $0x90] sm:$0xff] %vm1354_vm10, %v1347_v26  ;;  %v3066_v51 = vld [vmem:[#allocation26_spill] sm:$0xff] }
 0x273   :  { %989 = vst.msk [vmem:[%s2958_s6 + $0x60] sm:$0xff] %vm976_vm15, %v963_v27  ;;  %v2869_v21 = vpop.xlane.xlu0 %1313  ;;  %v922_v53 = vsel %vm2815_vm12, %v921_v36, %v917_v63  ;;  %v763_v0 = vsel %vm762_vm3, %v1607_v58, %v759_v17  ;;  %v940_v19 = vmul.f32 %v1611_v13, %v939_v35  ;;  %v924_v28 = vmul.f32 %v1613_v20, %v2819_v31  ;;  %vm944_vm6 = vmor %vm942_vm5, %vm943_vm4  ;;  %v3064_v27 = vld [vmem:[#allocation16_spill] sm:$0xff] }
 0x274   :  { %v973_v8 = vmul.f32 %v2315_v43, %v922_v53  ;;  %v768_v47 = vsel %vm2848_vm1, %v767_v61, %v763_v0  ;;  %1366 = vst.msk [vmem:[%s2957_s7 + $0x58] sm:$0xff] %vm1354_vm10, %v1340_v18  ;;  %1614 = vlog2.f32 %v2612_v62  ;;  %vm947_vm7 = vcmp.eq.f32.partialorder %v946_v33, 8.507059e+37  ;;  %v3065_v61 = vld [vmem:[#allocation25_spill] sm:$0xff] }
 0x275   :  { %v962_v59 = vmul.f32 %v2320_v40, %v768_v47  ;;  %v941_v1 = vadd.f32 %v1611_v13, %v940_v19  ;;  %v949_v43 = vor.u32 1.1754944e-38, %v948_v16  ;;  %v925_v22 = vsub.f32 1.0, %v924_v28  ;;  %v1318_v40 = vpop.xlane.xlu2 %1317 }
 0x276   :  { %999 = vst.msk [vmem:[%s2958_s6 + $0xb0] sm:$0xff] %vm976_vm15, %v973_v8  ;;  %1616 = vlog2.f32 %v2538_v38  ;;  %v932_v62 = vand.u32 2147483647, %v2819_v31  ;;  %v934_v45 = vand.u32 2147483648, %v2819_v31  ;;  %vm929_vm8 = vweird.f32 %v1613_v20 }
 0x277   :  { %988 = vst.msk [vmem:[%s2958_s6 + $0x58] sm:$0xff] %vm976_vm15, %v962_v59  ;;  %v945_v54 = vsel %vm944_vm6, %v1611_v13, %v941_v1  ;;  %1618 = vlog2.f32 %v2652_v10  ;;  %v926_v9 = vmul.f32 %v1613_v20, %v925_v22  ;;  %v1322_v41 = vpop.xlane.xlu1 %1321  ;;  %vm928_vm9 = vweird.f32 %v2819_v31 }
 0x278   :  { %v950_v58 = vsel %vm947_vm7, %v949_v43, %v945_v54  ;;  %1620 = vlog2.f32 %v2758_v23  ;;  %vm930_vm11 = vmor %vm928_vm9, %vm929_vm8  ;;  %v935_v10 = vor.u32 1.1754944e-38, %v934_v45  ;;  %vm933_vm12 = vcmp.eq.f32.partialorder %v932_v62, 8.507059e+37 }
 0x279   :  { %v975_v38 = vmul.f32 %v2325_v14, %v950_v58  ;;  %1622 = vlog2.f32 %v2672_v55  ;;  %v927_v56 = vadd.f32 %v1613_v20, %v926_v9 }
 0x27a   :  { %1624 = vlog2.f32 %v2797_v57  ;;  %v1615_v7 = vpop.eup %1614 }
 0x27b   :  { %v1320_v29 = vpop.xlane.xlu0 %1319  ;;  %1001 = vst.msk [vmem:[%s2958_s6 + $0xc0] sm:$0xff] %vm976_vm15, %v975_v38  ;;  %1626 = vlog2.f32 %v2819_v31  ;;  %v931_v14 = vsel %vm930_vm11, %v1613_v20, %v927_v56  ;;  %v1041_v55 = vmul.f32 0.6931472, %v1615_v7 }
 0x27c   :  { %v1617_v23 = vpop.eup %1616  ;;  %v936_v12 = vsel %vm933_vm12, %v935_v10, %v931_v14 }
 0x27d   :  { %v1619_v30 = vpop.eup %1618  ;;  %v1037_v42 = vmul.f32 0.6931472, %v1617_v23  ;;  %v974_v57 = vmul.f32 %v2334_v39, %v936_v12  ;;  %v1071_v5 = vadd.f32 %v1041_v55, %v3060_v34  ;;  %v1324_v60 = vpop.xlane.xlu2 %1323 }
 0x27e   :  { %v1621_v36 = vpop.eup %1620  ;;  %v1045_v24 = vmul.f32 0.6931472, %v1619_v30 }
 0x27f   :  { %v1623_v11 = vpop.eup %1622  ;;  %v1069_v15 = vadd.f32 %v1037_v42, %v3061_v52  ;;  %v1047_v49 = vmul.f32 0.6931472, %v1621_v36  ;;  %1000 = vst.msk [vmem:[%s2958_s6 + $0xb8] sm:$0xff] %vm976_vm15, %v974_v57  ;;  %v1348_v31 = vsub.f32 %v1071_v5, %v1318_v40  ;;  %v1328_v50 = vpop.xlane.xlu1 %1327 }
 0x280   :  { %v1625_v2 = vpop.eup %1624  ;;  %v1073_v13 = vadd.f32 %v1045_v24, %v3062_v6  ;;  %v1043_v25 = vmul.f32 0.6931472, %v1623_v11 }
 0x281   :  { %v1627_v46 = vpop.eup %1626  ;;  %v1346_v39 = vsub.f32 %v1069_v15, %v2869_v21  ;;  %v1074_v48 = vadd.f32 %v1047_v49, %v3063_v4  ;;  %v1051_v37 = vmul.f32 0.6931472, %v1625_v2  ;;  %1374 = vst.msk [vmem:[%s2957_s7 + $0x98] sm:$0xff] %vm1354_vm10, %v1348_v31 }
 0x282   :  { %v1350_v44 = vsub.f32 %v1073_v13, %v1322_v41  ;;  %v1072_v32 = vadd.f32 %v1043_v25, %v3064_v27  ;;  %v1049_v3 = vmul.f32 0.6931472, %v1627_v46 }
 0x283   :  { %1372 = vst.msk [vmem:[%s2957_s7 + $0x88] sm:$0xff] %vm1354_vm10, %v1346_v39  ;;  %v1351_v17 = vsub.f32 %v1074_v48, %v1324_v60  ;;  %v1076_v35 = vadd.f32 %v1051_v37, %v3065_v61  ;;  %v1326_v33 = vpop.xlane.xlu0 %1325 }
 0x284   :  { %1376 = vst.msk [vmem:[%s2957_s7 + $0xa8] sm:$0xff] %vm1354_vm10, %v1350_v44  ;;  %v1349_v63 = vsub.f32 %v1072_v32, %v1320_v29  ;;  %v1075_v18 = vadd.f32 %v1049_v3, %v3066_v51 }
 0x285   :  { %1377 = vst.msk [vmem:[%s2957_s7 + $0xb0] sm:$0xff] %vm1354_vm10, %v1351_v17  ;;  %v1353_v16 = vsub.f32 %v1076_v35, %v1328_v50 }
 0x286   :  { %1375 = vst.msk [vmem:[%s2957_s7 + $0xa0] sm:$0xff] %vm1354_vm10, %v1349_v63  ;;  %v1352_v26 = vsub.f32 %v1075_v18, %v1326_v33 }
 0x287   :  { %1379 = vst.msk [vmem:[%s2957_s7 + $0xc0] sm:$0xff] %vm1354_vm10, %v1353_v16 }
 0x288   :  { %1378 = vst.msk [vmem:[%s2957_s7 + $0xb8] sm:$0xff] %vm1354_vm10, %v1352_v26 }

</bundles_post_ra>
